<compile_context>
chip_gen: v6e
topology: v6e:2x2x1
jax: 0.10.0
libtpu: 0.0.40
codegen_flags: <defaults>
</compile_context>

<pallas_src>
import functools

import numpy as np

import jax
import jax.numpy as jnp
from jax.experimental import pallas as pl
from jax.experimental.pallas import tpu as pltpu


def _full_spec(shape):
    nd = len(shape)
    return pl.BlockSpec(shape, lambda i, _nd=nd: (0,) * _nd)


# ----------------------------------------------------------------------------
# Fused whole-network kernel (one image per grid step)
# ----------------------------------------------------------------------------
def _classifier_kernel(num_layers, x_ref, *refs):
    s_refs = refs[0:3 * num_layers:3]      # (3, Ho, H)          bf16 0/1 row-select
    g_refs = refs[1:3 * num_layers:3]      # (3*W*Cin, Wo*Cout)  bf16 folded conv+BN
    b_refs = refs[2:3 * num_layers:3]      # (1, Wo*Cout)        f32 folded BN shift
    wlin_ref = refs[3 * num_layers]        # (nfea, ncls)        bf16
    blin_ref = refs[3 * num_layers + 1]    # (1, ncls)           f32
    out_ref = refs[3 * num_layers + 2]     # (1, 1, ncls)        f32

    x2 = x_ref[0]                          # (H, W*Cin) bf16 activation of this image
    for l in range(num_layers):
        # kh taps: H-direction shift + stride-2 decimation + zero padding, done
        # on the MXU with exact 0/1 selection matrices (no strided slices, no
        # padded buffers to zero).
        taps = [
            jnp.dot(s_refs[l][k], x2,
                    preferred_element_type=jnp.float32).astype(jnp.bfloat16)
            for k in range(3)
        ]
        xcat = jnp.concatenate(taps, axis=-1)                 # (Ho, 3*W*Cin) bf16
        # Single big-K matmul per layer; Gcat folds the kw taps, the
        # W-direction stride-2 decimation/padding and the BatchNorm scale.
        y = jnp.dot(xcat, g_refs[l][...],
                    preferred_element_type=jnp.float32)       # (Ho, Wo*Cout) f32
        y = jnp.maximum(y + b_refs[l][...], 0.0)              # BN shift + ReLU, f32
        x2 = y.astype(jnp.bfloat16)                            # next layer's input

    # Final spatial map is 1x1 -> x2 is (1, nfea); Flatten/Dropout are identity.
    logits = jnp.dot(x2, wlin_ref[...],
                     preferred_element_type=jnp.float32) + blin_ref[...]
    out_ref[...] = logits.astype(out_ref.dtype).reshape(out_ref.shape)


# ----------------------------------------------------------------------------
# Parameter construction and one-time inference-time folding
# ----------------------------------------------------------------------------
def make_classifier_params(key, cfg, net="V8"):
    """Random parameters matching Classifier(net='V8', ...) structure."""
    assert net == "V8"
    tr = lambda c: int(cfg["netSi"] * c)
    chans = [cfg["imCh"], 32, 64, 128, 256, 512]     # imSi == 32 -> unchanged
    down = [1, 1, 1, 1, 1]
    params = {"convs": []}
    for i, _ in enumerate(down):
        cin = chans[i] if i == 0 else tr(chans[i])
        cout = tr(chans[i + 1])
        key, k1, k2, k3, k4 = jax.random.split(key, 5)
        params["convs"].append({
            "w": jax.random.normal(k1, (cout, cin, 3, 3), jnp.float32) * 0.1,
            "gamma": 1.0 + 0.1 * jax.random.normal(k2, (cout,), jnp.float32),
            "beta": 0.1 * jax.random.normal(k3, (cout,), jnp.float32),
            "mean": 0.1 * jax.random.normal(k4, (cout,), jnp.float32),
            "var": jnp.ones((cout,), jnp.float32),
        })
    nfea = tr(chans[-1]) * 1                         # finaldim = 1 for 'V' nets
    key, kw, kb = jax.random.split(key, 3)
    params["pred_w"] = jax.random.normal(kw, (cfg["num_classes"], nfea), jnp.float32) * 0.1
    params["pred_b"] = 0.1 * jax.random.normal(kb, (cfg["num_classes"],), jnp.float32)
    return params


def prepare_inference_params(params, im_size, eps=1e-5):
    """One-time, host-side folding of each Conv3x3(s=2,p=1)+BN(eval)+ReLU block
    into the (S, Gcat, b) matrices consumed by the fused kernel.

    For an image stored as X (H, W*Cin):
        conv(X)[oh, ow*Cout+co] = sum_{kh,kw,ci} Wf[co,ci,kh,kw] *
                                  X[2oh-1+kh, (2ow-1+kw)*Cin+ci]
                                = ( sum_kh (S_kh @ X) @ G_kh )[oh, ow*Cout+co]
    with S_kh[r, h] = [h == 2r-1+kh]                  (shift + decimation + pad)
    and  G_kh[iw*Cin+ci, ow*Cout+co] = Wf[co,ci,kh,kw] iff iw == 2ow-1+kw.
    The three kh pieces are concatenated so each layer is one K = 3*W*Cin
    matmul in the kernel; BN scale is folded into Wf, BN shift into b.
    """
    # TODO(synk): BatchNorm uses inference-mode running statistics; training-mode
    # batch statistics are not implemented.
    layers = []
    H = im_size
    for layer in params["convs"]:
        w = np.asarray(layer["w"], np.float32)               # (cout, cin, 3, 3)
        scale = np.asarray(layer["gamma"]) / np.sqrt(np.asarray(layer["var"]) + eps)
        shift = np.asarray(layer["beta"]) - np.asarray(layer["mean"]) * scale
        wf = w * scale[:, None, None, None]
        cout, cin = wf.shape[0], wf.shape[1]
        W = H
        Ho, Wo = H // 2, W // 2

        S = np.zeros((3, Ho, H), np.float32)
        for kh in range(3):
            for r in range(Ho):
                h = 2 * r - 1 + kh
                if 0 <= h < H:
                    S[kh, r, h] = 1.0

        G = np.zeros((3, W * cin, Wo * cout), np.float32)
        for kh in range(3):
            for ow in range(Wo):
                for kw in range(3):
                    iw = 2 * ow - 1 + kw
                    if 0 <= iw < W:
                        G[kh, iw * cin:(iw + 1) * cin,
                          ow * cout:(ow + 1) * cout] = wf[:, :, kh, kw].T

        layers.append({
            "S": jnp.asarray(S, jnp.bfloat16),
            "G": jnp.asarray(G.reshape(3 * W * cin, Wo * cout), jnp.bfloat16),
            "b": jnp.asarray(np.tile(shift, Wo).reshape(1, Wo * cout), jnp.float32),
        })
        H = Ho
    assert H == 1, "V8 forward assumes imSi == 2**num_convs (1x1 final map)"
    return {
        "layers": layers,
        "pred_w": jnp.asarray(np.asarray(params["pred_w"]).T, jnp.bfloat16),  # (nfea, ncls)
        "pred_b": jnp.asarray(np.asarray(params["pred_b"]).reshape(1, -1), jnp.float32),
    }


# ----------------------------------------------------------------------------
# Classifier forward (single fused pallas_call, batch on the grid)
# ----------------------------------------------------------------------------
@jax.jit
def classifier_forward(x_nchw, prepped):
    # self.mp / self.mp2 = Identity ('V' net), Dropout = Identity ('drop' not
    # in cfg); Flatten is trivial because the final spatial map is 1x1.
    N, C, H, W = x_nchw.shape
    layers = prepped["layers"]
    num_layers = len(layers)
    assert H == W == 2 ** num_layers, "V8 forward assumes imSi == 2**num_convs"
    ncls = int(prepped["pred_b"].shape[1])

    # NCHW -> per-image (H, W*C) row-major matrices; cast to bf16 once.
    x = jnp.transpose(x_nchw, (0, 2, 3, 1)).reshape(N, H, W * C).astype(jnp.bfloat16)

    inputs = [x]
    for lyr in layers:
        inputs += [lyr["S"], lyr["G"], lyr["b"]]
    inputs += [prepped["pred_w"], prepped["pred_b"]]

    in_specs = [pl.BlockSpec((1, H, W * C), lambda i: (i, 0, 0))]
    in_specs += [_full_spec(a.shape) for a in inputs[1:]]
    # TODO(synk): the ~17 tiny weight/bias inputs could be packed into one flat
    # buffer to shave DMA-descriptor setup; kept separate for shape clarity.

    kernel = functools.partial(_classifier_kernel, num_layers)
    out3 = pl.pallas_call(
        kernel,
        out_shape=jax.ShapeDtypeStruct((N, 1, ncls), jnp.float32),
        grid=(N,),
        in_specs=in_specs,
        out_specs=pl.BlockSpec((1, 1, ncls), lambda i: (i, 0, 0)),
        compiler_params=pltpu.CompilerParams(
            dimension_semantics=("parallel",),       # shard batch across v7x TCs
            vmem_limit_bytes=32 * 1024 * 1024),      # total footprint is < 1 MiB
    )(*inputs)
    return out3.reshape(N, ncls)


if __name__ == "__main__":
    cfg = {"netSi": 0.125, "imCh": 4, "imSi": 32, "num_classes": 10}
    key = jax.random.PRNGKey(0)
    kp, kx = jax.random.split(key)
    params = make_classifier_params(kp, cfg, net="V8")
    prepped = prepare_inference_params(params, cfg["imSi"])

    x = jax.random.normal(kx, (2, cfg["imCh"], cfg["imSi"], cfg["imSi"]), jnp.float32)

    logits = classifier_forward(x, prepped)
    jax.block_until_ready(logits)
    assert logits.shape == (2, cfg["num_classes"])
    print("KERNEL_OK")
</pallas_src>

<mosaic_0001>
module attributes {stable_mosaic.version = 11 : i64} {
  func.func @_classifier_kernel(%arg0: i32, %arg1: memref<1x32x128xbf16, #tpu.memory_space<vmem>>, %arg2: memref<3x16x32xbf16, #tpu.memory_space<vmem>>, %arg3: memref<384x64xbf16, #tpu.memory_space<vmem>>, %arg4: memref<1x64xf32, #tpu.memory_space<vmem>>, %arg5: memref<3x8x16xbf16, #tpu.memory_space<vmem>>, %arg6: memref<192x64xbf16, #tpu.memory_space<vmem>>, %arg7: memref<1x64xf32, #tpu.memory_space<vmem>>, %arg8: memref<3x4x8xbf16, #tpu.memory_space<vmem>>, %arg9: memref<192x64xbf16, #tpu.memory_space<vmem>>, %arg10: memref<1x64xf32, #tpu.memory_space<vmem>>, %arg11: memref<3x2x4xbf16, #tpu.memory_space<vmem>>, %arg12: memref<192x64xbf16, #tpu.memory_space<vmem>>, %arg13: memref<1x64xf32, #tpu.memory_space<vmem>>, %arg14: memref<3x1x2xbf16, #tpu.memory_space<vmem>>, %arg15: memref<192x64xbf16, #tpu.memory_space<vmem>>, %arg16: memref<1x64xf32, #tpu.memory_space<vmem>>, %arg17: memref<64x10xbf16, #tpu.memory_space<vmem>>, %arg18: memref<1x10xf32, #tpu.memory_space<vmem>>, %arg19: memref<1x1x10xf32, #tpu.memory_space<vmem>>) attributes {dimension_semantics = [#tpu.dimension_semantics<parallel>], iteration_bounds = array<i64: 2>, scalar_prefetch = 0 : i64, scratch_operands = 0 : i64, tpu.core_type = #tpu.core_type<tc>, window_params = [{transform_indices = @transform_0, window_bounds = array<i64: 1, 32, 128>}, {pipeline_mode = #tpu.pipeline_mode<synchronous>, transform_indices = @transform_1, window_bounds = array<i64: 3, 16, 32>}, {pipeline_mode = #tpu.pipeline_mode<synchronous>, transform_indices = @transform_2, window_bounds = array<i64: 384, 64>}, {pipeline_mode = #tpu.pipeline_mode<synchronous>, transform_indices = @transform_3, window_bounds = array<i64: 1, 64>}, {pipeline_mode = #tpu.pipeline_mode<synchronous>, transform_indices = @transform_4, window_bounds = array<i64: 3, 8, 16>}, {pipeline_mode = #tpu.pipeline_mode<synchronous>, transform_indices = @transform_5, window_bounds = array<i64: 192, 64>}, {pipeline_mode = #tpu.pipeline_mode<synchronous>, transform_indices = @transform_6, window_bounds = array<i64: 1, 64>}, {pipeline_mode = #tpu.pipeline_mode<synchronous>, transform_indices = @transform_7, window_bounds = array<i64: 3, 4, 8>}, {pipeline_mode = #tpu.pipeline_mode<synchronous>, transform_indices = @transform_8, window_bounds = array<i64: 192, 64>}, {pipeline_mode = #tpu.pipeline_mode<synchronous>, transform_indices = @transform_9, window_bounds = array<i64: 1, 64>}, {pipeline_mode = #tpu.pipeline_mode<synchronous>, transform_indices = @transform_10, window_bounds = array<i64: 3, 2, 4>}, {pipeline_mode = #tpu.pipeline_mode<synchronous>, transform_indices = @transform_11, window_bounds = array<i64: 192, 64>}, {pipeline_mode = #tpu.pipeline_mode<synchronous>, transform_indices = @transform_12, window_bounds = array<i64: 1, 64>}, {pipeline_mode = #tpu.pipeline_mode<synchronous>, transform_indices = @transform_13, window_bounds = array<i64: 3, 1, 2>}, {pipeline_mode = #tpu.pipeline_mode<synchronous>, transform_indices = @transform_14, window_bounds = array<i64: 192, 64>}, {pipeline_mode = #tpu.pipeline_mode<synchronous>, transform_indices = @transform_15, window_bounds = array<i64: 1, 64>}, {pipeline_mode = #tpu.pipeline_mode<synchronous>, transform_indices = @transform_16, window_bounds = array<i64: 64, 10>}, {pipeline_mode = #tpu.pipeline_mode<synchronous>, transform_indices = @transform_17, window_bounds = array<i64: 1, 10>}, {transform_indices = @transform_18, window_bounds = array<i64: 1, 1, 10>}]} {
    %c0 = arith.constant 0 : index
    %c0_0 = arith.constant 0 : index
    %c0_1 = arith.constant 0 : index
    %0 = vector.load %arg1[%c0, %c0_0, %c0_1] : memref<1x32x128xbf16, #tpu.memory_space<vmem>>, vector<1x32x128xbf16>
    %1 = vector.shape_cast %0 : vector<1x32x128xbf16> to vector<32x128xbf16>
    %c0_2 = arith.constant 0 : index
    %c0_3 = arith.constant 0 : index
    %c0_4 = arith.constant 0 : index
    %2 = vector.load %arg2[%c0_2, %c0_3, %c0_4] : memref<3x16x32xbf16, #tpu.memory_space<vmem>>, vector<1x16x32xbf16>
    %3 = vector.shape_cast %2 : vector<1x16x32xbf16> to vector<16x32xbf16>
    %cst = arith.constant dense<0.000000e+00> : vector<16x128xf32>
    %4 = tpu.matmul %3, %1, %cst {dimension_numbers = #tpu.dot_dimension_numbers<[1], [0], [0], [1], [0, 0, 1, 1], [], []>} : vector<16x32xbf16>, vector<32x128xbf16>, vector<16x128xf32> -> vector<16x128xf32>
    %5 = arith.truncf %4 : vector<16x128xf32> to vector<16x128xbf16>
    %c1 = arith.constant 1 : index
    %c0_5 = arith.constant 0 : index
    %c0_6 = arith.constant 0 : index
    %6 = vector.load %arg2[%c1, %c0_5, %c0_6] : memref<3x16x32xbf16, #tpu.memory_space<vmem>>, vector<1x16x32xbf16>
    %7 = vector.shape_cast %6 : vector<1x16x32xbf16> to vector<16x32xbf16>
    %cst_7 = arith.constant dense<0.000000e+00> : vector<16x128xf32>
    %8 = tpu.matmul %7, %1, %cst_7 {dimension_numbers = #tpu.dot_dimension_numbers<[1], [0], [0], [1], [0, 0, 1, 1], [], []>} : vector<16x32xbf16>, vector<32x128xbf16>, vector<16x128xf32> -> vector<16x128xf32>
    %9 = arith.truncf %8 : vector<16x128xf32> to vector<16x128xbf16>
    %c2 = arith.constant 2 : index
    %c0_8 = arith.constant 0 : index
    %c0_9 = arith.constant 0 : index
    %10 = vector.load %arg2[%c2, %c0_8, %c0_9] : memref<3x16x32xbf16, #tpu.memory_space<vmem>>, vector<1x16x32xbf16>
    %11 = vector.shape_cast %10 : vector<1x16x32xbf16> to vector<16x32xbf16>
    %cst_10 = arith.constant dense<0.000000e+00> : vector<16x128xf32>
    %12 = tpu.matmul %11, %1, %cst_10 {dimension_numbers = #tpu.dot_dimension_numbers<[1], [0], [0], [1], [0, 0, 1, 1], [], []>} : vector<16x32xbf16>, vector<32x128xbf16>, vector<16x128xf32> -> vector<16x128xf32>
    %13 = arith.truncf %12 : vector<16x128xf32> to vector<16x128xbf16>
    %14 = tpu.concatenate %5, %9, %13 in 1 : vector<16x128xbf16>, vector<16x128xbf16>, vector<16x128xbf16> -> vector<16x384xbf16>
    %c0_11 = arith.constant 0 : index
    %c0_12 = arith.constant 0 : index
    %15 = vector.load %arg3[%c0_11, %c0_12] : memref<384x64xbf16, #tpu.memory_space<vmem>>, vector<384x64xbf16>
    %cst_13 = arith.constant dense<0.000000e+00> : vector<16x64xf32>
    %16 = tpu.matmul %14, %15, %cst_13 {dimension_numbers = #tpu.dot_dimension_numbers<[1], [0], [0], [1], [0, 0, 1, 1], [], []>} : vector<16x384xbf16>, vector<384x64xbf16>, vector<16x64xf32> -> vector<16x64xf32>
    %c0_14 = arith.constant 0 : index
    %c0_15 = arith.constant 0 : index
    %17 = vector.load %arg4[%c0_14, %c0_15] : memref<1x64xf32, #tpu.memory_space<vmem>>, vector<1x64xf32>
    %18 = vector.broadcast %17 : vector<1x64xf32> to vector<16x64xf32>
    %19 = arith.addf %16, %18 : vector<16x64xf32>
    %cst_16 = arith.constant 0.000000e+00 : f32
    %20 = vector.broadcast %cst_16 : f32 to vector<16x64xf32>
    %21 = arith.maximumf %19, %20 : vector<16x64xf32>
    %22 = arith.truncf %21 : vector<16x64xf32> to vector<16x64xbf16>
    %c0_17 = arith.constant 0 : index
    %c0_18 = arith.constant 0 : index
    %c0_19 = arith.constant 0 : index
    %23 = vector.load %arg5[%c0_17, %c0_18, %c0_19] : memref<3x8x16xbf16, #tpu.memory_space<vmem>>, vector<1x8x16xbf16>
    %24 = vector.shape_cast %23 : vector<1x8x16xbf16> to vector<8x16xbf16>
    %cst_20 = arith.constant dense<0.000000e+00> : vector<8x64xf32>
    %25 = tpu.matmul %24, %22, %cst_20 {dimension_numbers = #tpu.dot_dimension_numbers<[1], [0], [0], [1], [0, 0, 1, 1], [], []>} : vector<8x16xbf16>, vector<16x64xbf16>, vector<8x64xf32> -> vector<8x64xf32>
    %26 = arith.truncf %25 : vector<8x64xf32> to vector<8x64xbf16>
    %c1_21 = arith.constant 1 : index
    %c0_22 = arith.constant 0 : index
    %c0_23 = arith.constant 0 : index
    %27 = vector.load %arg5[%c1_21, %c0_22, %c0_23] : memref<3x8x16xbf16, #tpu.memory_space<vmem>>, vector<1x8x16xbf16>
    %28 = vector.shape_cast %27 : vector<1x8x16xbf16> to vector<8x16xbf16>
    %cst_24 = arith.constant dense<0.000000e+00> : vector<8x64xf32>
    %29 = tpu.matmul %28, %22, %cst_24 {dimension_numbers = #tpu.dot_dimension_numbers<[1], [0], [0], [1], [0, 0, 1, 1], [], []>} : vector<8x16xbf16>, vector<16x64xbf16>, vector<8x64xf32> -> vector<8x64xf32>
    %30 = arith.truncf %29 : vector<8x64xf32> to vector<8x64xbf16>
    %c2_25 = arith.constant 2 : index
    %c0_26 = arith.constant 0 : index
    %c0_27 = arith.constant 0 : index
    %31 = vector.load %arg5[%c2_25, %c0_26, %c0_27] : memref<3x8x16xbf16, #tpu.memory_space<vmem>>, vector<1x8x16xbf16>
    %32 = vector.shape_cast %31 : vector<1x8x16xbf16> to vector<8x16xbf16>
    %cst_28 = arith.constant dense<0.000000e+00> : vector<8x64xf32>
    %33 = tpu.matmul %32, %22, %cst_28 {dimension_numbers = #tpu.dot_dimension_numbers<[1], [0], [0], [1], [0, 0, 1, 1], [], []>} : vector<8x16xbf16>, vector<16x64xbf16>, vector<8x64xf32> -> vector<8x64xf32>
    %34 = arith.truncf %33 : vector<8x64xf32> to vector<8x64xbf16>
    %35 = tpu.concatenate %26, %30, %34 in 1 : vector<8x64xbf16>, vector<8x64xbf16>, vector<8x64xbf16> -> vector<8x192xbf16>
    %c0_29 = arith.constant 0 : index
    %c0_30 = arith.constant 0 : index
    %36 = vector.load %arg6[%c0_29, %c0_30] : memref<192x64xbf16, #tpu.memory_space<vmem>>, vector<192x64xbf16>
    %cst_31 = arith.constant dense<0.000000e+00> : vector<8x64xf32>
    %37 = tpu.matmul %35, %36, %cst_31 {dimension_numbers = #tpu.dot_dimension_numbers<[1], [0], [0], [1], [0, 0, 1, 1], [], []>} : vector<8x192xbf16>, vector<192x64xbf16>, vector<8x64xf32> -> vector<8x64xf32>
    %c0_32 = arith.constant 0 : index
    %c0_33 = arith.constant 0 : index
    %38 = vector.load %arg7[%c0_32, %c0_33] : memref<1x64xf32, #tpu.memory_space<vmem>>, vector<1x64xf32>
    %39 = vector.broadcast %38 : vector<1x64xf32> to vector<8x64xf32>
    %40 = arith.addf %37, %39 : vector<8x64xf32>
    %cst_34 = arith.constant 0.000000e+00 : f32
    %41 = vector.broadcast %cst_34 : f32 to vector<8x64xf32>
    %42 = arith.maximumf %40, %41 : vector<8x64xf32>
    %43 = arith.truncf %42 : vector<8x64xf32> to vector<8x64xbf16>
    %c0_35 = arith.constant 0 : index
    %c0_36 = arith.constant 0 : index
    %c0_37 = arith.constant 0 : index
    %44 = vector.load %arg8[%c0_35, %c0_36, %c0_37] : memref<3x4x8xbf16, #tpu.memory_space<vmem>>, vector<1x4x8xbf16>
    %45 = vector.shape_cast %44 : vector<1x4x8xbf16> to vector<4x8xbf16>
    %cst_38 = arith.constant dense<0.000000e+00> : vector<4x64xf32>
    %46 = tpu.matmul %45, %43, %cst_38 {dimension_numbers = #tpu.dot_dimension_numbers<[1], [0], [0], [1], [0, 0, 1, 1], [], []>} : vector<4x8xbf16>, vector<8x64xbf16>, vector<4x64xf32> -> vector<4x64xf32>
    %47 = arith.truncf %46 : vector<4x64xf32> to vector<4x64xbf16>
    %c1_39 = arith.constant 1 : index
    %c0_40 = arith.constant 0 : index
    %c0_41 = arith.constant 0 : index
    %48 = vector.load %arg8[%c1_39, %c0_40, %c0_41] : memref<3x4x8xbf16, #tpu.memory_space<vmem>>, vector<1x4x8xbf16>
    %49 = vector.shape_cast %48 : vector<1x4x8xbf16> to vector<4x8xbf16>
    %cst_42 = arith.constant dense<0.000000e+00> : vector<4x64xf32>
    %50 = tpu.matmul %49, %43, %cst_42 {dimension_numbers = #tpu.dot_dimension_numbers<[1], [0], [0], [1], [0, 0, 1, 1], [], []>} : vector<4x8xbf16>, vector<8x64xbf16>, vector<4x64xf32> -> vector<4x64xf32>
    %51 = arith.truncf %50 : vector<4x64xf32> to vector<4x64xbf16>
    %c2_43 = arith.constant 2 : index
    %c0_44 = arith.constant 0 : index
    %c0_45 = arith.constant 0 : index
    %52 = vector.load %arg8[%c2_43, %c0_44, %c0_45] : memref<3x4x8xbf16, #tpu.memory_space<vmem>>, vector<1x4x8xbf16>
    %53 = vector.shape_cast %52 : vector<1x4x8xbf16> to vector<4x8xbf16>
    %cst_46 = arith.constant dense<0.000000e+00> : vector<4x64xf32>
    %54 = tpu.matmul %53, %43, %cst_46 {dimension_numbers = #tpu.dot_dimension_numbers<[1], [0], [0], [1], [0, 0, 1, 1], [], []>} : vector<4x8xbf16>, vector<8x64xbf16>, vector<4x64xf32> -> vector<4x64xf32>
    %55 = arith.truncf %54 : vector<4x64xf32> to vector<4x64xbf16>
    %56 = tpu.concatenate %47, %51, %55 in 1 : vector<4x64xbf16>, vector<4x64xbf16>, vector<4x64xbf16> -> vector<4x192xbf16>
    %c0_47 = arith.constant 0 : index
    %c0_48 = arith.constant 0 : index
    %57 = vector.load %arg9[%c0_47, %c0_48] : memref<192x64xbf16, #tpu.memory_space<vmem>>, vector<192x64xbf16>
    %cst_49 = arith.constant dense<0.000000e+00> : vector<4x64xf32>
    %58 = tpu.matmul %56, %57, %cst_49 {dimension_numbers = #tpu.dot_dimension_numbers<[1], [0], [0], [1], [0, 0, 1, 1], [], []>} : vector<4x192xbf16>, vector<192x64xbf16>, vector<4x64xf32> -> vector<4x64xf32>
    %c0_50 = arith.constant 0 : index
    %c0_51 = arith.constant 0 : index
    %59 = vector.load %arg10[%c0_50, %c0_51] : memref<1x64xf32, #tpu.memory_space<vmem>>, vector<1x64xf32>
    %60 = vector.broadcast %59 : vector<1x64xf32> to vector<4x64xf32>
    %61 = arith.addf %58, %60 : vector<4x64xf32>
    %cst_52 = arith.constant 0.000000e+00 : f32
    %62 = vector.broadcast %cst_52 : f32 to vector<4x64xf32>
    %63 = arith.maximumf %61, %62 : vector<4x64xf32>
    %64 = arith.truncf %63 : vector<4x64xf32> to vector<4x64xbf16>
    %c0_53 = arith.constant 0 : index
    %c0_54 = arith.constant 0 : index
    %c0_55 = arith.constant 0 : index
    %65 = vector.load %arg11[%c0_53, %c0_54, %c0_55] : memref<3x2x4xbf16, #tpu.memory_space<vmem>>, vector<1x2x4xbf16>
    %66 = vector.shape_cast %65 : vector<1x2x4xbf16> to vector<2x4xbf16>
    %cst_56 = arith.constant dense<0.000000e+00> : vector<2x64xf32>
    %67 = tpu.matmul %66, %64, %cst_56 {dimension_numbers = #tpu.dot_dimension_numbers<[1], [0], [0], [1], [0, 0, 1, 1], [], []>} : vector<2x4xbf16>, vector<4x64xbf16>, vector<2x64xf32> -> vector<2x64xf32>
    %68 = arith.truncf %67 : vector<2x64xf32> to vector<2x64xbf16>
    %c1_57 = arith.constant 1 : index
    %c0_58 = arith.constant 0 : index
    %c0_59 = arith.constant 0 : index
    %69 = vector.load %arg11[%c1_57, %c0_58, %c0_59] : memref<3x2x4xbf16, #tpu.memory_space<vmem>>, vector<1x2x4xbf16>
    %70 = vector.shape_cast %69 : vector<1x2x4xbf16> to vector<2x4xbf16>
    %cst_60 = arith.constant dense<0.000000e+00> : vector<2x64xf32>
    %71 = tpu.matmul %70, %64, %cst_60 {dimension_numbers = #tpu.dot_dimension_numbers<[1], [0], [0], [1], [0, 0, 1, 1], [], []>} : vector<2x4xbf16>, vector<4x64xbf16>, vector<2x64xf32> -> vector<2x64xf32>
    %72 = arith.truncf %71 : vector<2x64xf32> to vector<2x64xbf16>
    %c2_61 = arith.constant 2 : index
    %c0_62 = arith.constant 0 : index
    %c0_63 = arith.constant 0 : index
    %73 = vector.load %arg11[%c2_61, %c0_62, %c0_63] : memref<3x2x4xbf16, #tpu.memory_space<vmem>>, vector<1x2x4xbf16>
    %74 = vector.shape_cast %73 : vector<1x2x4xbf16> to vector<2x4xbf16>
    %cst_64 = arith.constant dense<0.000000e+00> : vector<2x64xf32>
    %75 = tpu.matmul %74, %64, %cst_64 {dimension_numbers = #tpu.dot_dimension_numbers<[1], [0], [0], [1], [0, 0, 1, 1], [], []>} : vector<2x4xbf16>, vector<4x64xbf16>, vector<2x64xf32> -> vector<2x64xf32>
    %76 = arith.truncf %75 : vector<2x64xf32> to vector<2x64xbf16>
    %77 = tpu.concatenate %68, %72, %76 in 1 : vector<2x64xbf16>, vector<2x64xbf16>, vector<2x64xbf16> -> vector<2x192xbf16>
    %c0_65 = arith.constant 0 : index
    %c0_66 = arith.constant 0 : index
    %78 = vector.load %arg12[%c0_65, %c0_66] : memref<192x64xbf16, #tpu.memory_space<vmem>>, vector<192x64xbf16>
    %cst_67 = arith.constant dense<0.000000e+00> : vector<2x64xf32>
    %79 = tpu.matmul %77, %78, %cst_67 {dimension_numbers = #tpu.dot_dimension_numbers<[1], [0], [0], [1], [0, 0, 1, 1], [], []>} : vector<2x192xbf16>, vector<192x64xbf16>, vector<2x64xf32> -> vector<2x64xf32>
    %c0_68 = arith.constant 0 : index
    %c0_69 = arith.constant 0 : index
    %80 = vector.load %arg13[%c0_68, %c0_69] : memref<1x64xf32, #tpu.memory_space<vmem>>, vector<1x64xf32>
    %81 = vector.broadcast %80 : vector<1x64xf32> to vector<2x64xf32>
    %82 = arith.addf %79, %81 : vector<2x64xf32>
    %cst_70 = arith.constant 0.000000e+00 : f32
    %83 = vector.broadcast %cst_70 : f32 to vector<2x64xf32>
    %84 = arith.maximumf %82, %83 : vector<2x64xf32>
    %85 = arith.truncf %84 : vector<2x64xf32> to vector<2x64xbf16>
    %c0_71 = arith.constant 0 : index
    %c0_72 = arith.constant 0 : index
    %c0_73 = arith.constant 0 : index
    %86 = vector.load %arg14[%c0_71, %c0_72, %c0_73] : memref<3x1x2xbf16, #tpu.memory_space<vmem>>, vector<1x1x2xbf16>
    %87 = vector.shape_cast %86 : vector<1x1x2xbf16> to vector<1x2xbf16>
    %cst_74 = arith.constant dense<0.000000e+00> : vector<1x64xf32>
    %88 = tpu.matmul %87, %85, %cst_74 {dimension_numbers = #tpu.dot_dimension_numbers<[1], [0], [0], [1], [0, 0, 1, 1], [], []>} : vector<1x2xbf16>, vector<2x64xbf16>, vector<1x64xf32> -> vector<1x64xf32>
    %89 = arith.truncf %88 : vector<1x64xf32> to vector<1x64xbf16>
    %c1_75 = arith.constant 1 : index
    %c0_76 = arith.constant 0 : index
    %c0_77 = arith.constant 0 : index
    %90 = vector.load %arg14[%c1_75, %c0_76, %c0_77] : memref<3x1x2xbf16, #tpu.memory_space<vmem>>, vector<1x1x2xbf16>
    %91 = vector.shape_cast %90 : vector<1x1x2xbf16> to vector<1x2xbf16>
    %cst_78 = arith.constant dense<0.000000e+00> : vector<1x64xf32>
    %92 = tpu.matmul %91, %85, %cst_78 {dimension_numbers = #tpu.dot_dimension_numbers<[1], [0], [0], [1], [0, 0, 1, 1], [], []>} : vector<1x2xbf16>, vector<2x64xbf16>, vector<1x64xf32> -> vector<1x64xf32>
    %93 = arith.truncf %92 : vector<1x64xf32> to vector<1x64xbf16>
    %c2_79 = arith.constant 2 : index
    %c0_80 = arith.constant 0 : index
    %c0_81 = arith.constant 0 : index
    %94 = vector.load %arg14[%c2_79, %c0_80, %c0_81] : memref<3x1x2xbf16, #tpu.memory_space<vmem>>, vector<1x1x2xbf16>
    %95 = vector.shape_cast %94 : vector<1x1x2xbf16> to vector<1x2xbf16>
    %cst_82 = arith.constant dense<0.000000e+00> : vector<1x64xf32>
    %96 = tpu.matmul %95, %85, %cst_82 {dimension_numbers = #tpu.dot_dimension_numbers<[1], [0], [0], [1], [0, 0, 1, 1], [], []>} : vector<1x2xbf16>, vector<2x64xbf16>, vector<1x64xf32> -> vector<1x64xf32>
    %97 = arith.truncf %96 : vector<1x64xf32> to vector<1x64xbf16>
    %98 = tpu.concatenate %89, %93, %97 in 1 : vector<1x64xbf16>, vector<1x64xbf16>, vector<1x64xbf16> -> vector<1x192xbf16>
    %c0_83 = arith.constant 0 : index
    %c0_84 = arith.constant 0 : index
    %99 = vector.load %arg15[%c0_83, %c0_84] : memref<192x64xbf16, #tpu.memory_space<vmem>>, vector<192x64xbf16>
    %cst_85 = arith.constant dense<0.000000e+00> : vector<1x64xf32>
    %100 = tpu.matmul %98, %99, %cst_85 {dimension_numbers = #tpu.dot_dimension_numbers<[1], [0], [0], [1], [0, 0, 1, 1], [], []>} : vector<1x192xbf16>, vector<192x64xbf16>, vector<1x64xf32> -> vector<1x64xf32>
    %c0_86 = arith.constant 0 : index
    %c0_87 = arith.constant 0 : index
    %101 = vector.load %arg16[%c0_86, %c0_87] : memref<1x64xf32, #tpu.memory_space<vmem>>, vector<1x64xf32>
    %102 = arith.addf %100, %101 : vector<1x64xf32>
    %cst_88 = arith.constant 0.000000e+00 : f32
    %103 = vector.broadcast %cst_88 : f32 to vector<1x64xf32>
    %104 = arith.maximumf %102, %103 : vector<1x64xf32>
    %105 = arith.truncf %104 : vector<1x64xf32> to vector<1x64xbf16>
    %c0_89 = arith.constant 0 : index
    %c0_90 = arith.constant 0 : index
    %106 = vector.load %arg17[%c0_89, %c0_90] : memref<64x10xbf16, #tpu.memory_space<vmem>>, vector<64x10xbf16>
    %cst_91 = arith.constant dense<0.000000e+00> : vector<1x10xf32>
    %107 = tpu.matmul %105, %106, %cst_91 {dimension_numbers = #tpu.dot_dimension_numbers<[1], [0], [0], [1], [0, 0, 1, 1], [], []>} : vector<1x64xbf16>, vector<64x10xbf16>, vector<1x10xf32> -> vector<1x10xf32>
    %c0_92 = arith.constant 0 : index
    %c0_93 = arith.constant 0 : index
    %108 = vector.load %arg18[%c0_92, %c0_93] : memref<1x10xf32, #tpu.memory_space<vmem>>, vector<1x10xf32>
    %109 = arith.addf %107, %108 : vector<1x10xf32>
    %110 = vector.shape_cast %109 : vector<1x10xf32> to vector<1x1x10xf32>
    %c0_94 = arith.constant 0 : index
    %c0_95 = arith.constant 0 : index
    %c0_96 = arith.constant 0 : index
    %111 = vector.load %arg19[%c0_94, %c0_95, %c0_96] : memref<1x1x10xf32, #tpu.memory_space<vmem>>, vector<1x1x10xf32>
    tpu.vector_store %arg19[%c0_94, %c0_95, %c0_96], %110 {strides = array<i32>} : memref<1x1x10xf32, #tpu.memory_space<vmem>>, vector<1x1x10xf32>,
    return
  }
  func.func @transform_0(%arg0: i32) -> (i32, i32, i32) {
    %c0_i32 = arith.constant 0 : i32
    %c0_i32_0 = arith.constant 0 : i32
    %c0_i32_1 = arith.constant 0 : i32
    return %arg0, %c0_i32, %c0_i32_0 : i32, i32, i32
  }
  func.func @transform_1(%arg0: i32) -> (i32, i32, i32) {
    %c0_i32 = arith.constant 0 : i32
    %c0_i32_0 = arith.constant 0 : i32
    %c0_i32_1 = arith.constant 0 : i32
    %c0_i32_2 = arith.constant 0 : i32
    return %c0_i32, %c0_i32_0, %c0_i32_1 : i32, i32, i32
  }
  func.func @transform_2(%arg0: i32) -> (i32, i32) {
    %c0_i32 = arith.constant 0 : i32
    %c0_i32_0 = arith.constant 0 : i32
    %c0_i32_1 = arith.constant 0 : i32
    return %c0_i32, %c0_i32_0 : i32, i32
  }
  func.func @transform_3(%arg0: i32) -> (i32, i32) {
    %c0_i32 = arith.constant 0 : i32
    %c0_i32_0 = arith.constant 0 : i32
    %c0_i32_1 = arith.constant 0 : i32
    return %c0_i32, %c0_i32_0 : i32, i32
  }
  func.func @transform_4(%arg0: i32) -> (i32, i32, i32) {
    %c0_i32 = arith.constant 0 : i32
    %c0_i32_0 = arith.constant 0 : i32
    %c0_i32_1 = arith.constant 0 : i32
    %c0_i32_2 = arith.constant 0 : i32
    return %c0_i32, %c0_i32_0, %c0_i32_1 : i32, i32, i32
  }
  func.func @transform_5(%arg0: i32) -> (i32, i32) {
    %c0_i32 = arith.constant 0 : i32
    %c0_i32_0 = arith.constant 0 : i32
    %c0_i32_1 = arith.constant 0 : i32
    return %c0_i32, %c0_i32_0 : i32, i32
  }
  func.func @transform_6(%arg0: i32) -> (i32, i32) {
    %c0_i32 = arith.constant 0 : i32
    %c0_i32_0 = arith.constant 0 : i32
    %c0_i32_1 = arith.constant 0 : i32
    return %c0_i32, %c0_i32_0 : i32, i32
  }
  func.func @transform_7(%arg0: i32) -> (i32, i32, i32) {
    %c0_i32 = arith.constant 0 : i32
    %c0_i32_0 = arith.constant 0 : i32
    %c0_i32_1 = arith.constant 0 : i32
    %c0_i32_2 = arith.constant 0 : i32
    return %c0_i32, %c0_i32_0, %c0_i32_1 : i32, i32, i32
  }
  func.func @transform_8(%arg0: i32) -> (i32, i32) {
    %c0_i32 = arith.constant 0 : i32
    %c0_i32_0 = arith.constant 0 : i32
    %c0_i32_1 = arith.constant 0 : i32
    return %c0_i32, %c0_i32_0 : i32, i32
  }
  func.func @transform_9(%arg0: i32) -> (i32, i32) {
    %c0_i32 = arith.constant 0 : i32
    %c0_i32_0 = arith.constant 0 : i32
    %c0_i32_1 = arith.constant 0 : i32
    return %c0_i32, %c0_i32_0 : i32, i32
  }
  func.func @transform_10(%arg0: i32) -> (i32, i32, i32) {
    %c0_i32 = arith.constant 0 : i32
    %c0_i32_0 = arith.constant 0 : i32
    %c0_i32_1 = arith.constant 0 : i32
    %c0_i32_2 = arith.constant 0 : i32
    return %c0_i32, %c0_i32_0, %c0_i32_1 : i32, i32, i32
  }
  func.func @transform_11(%arg0: i32) -> (i32, i32) {
    %c0_i32 = arith.constant 0 : i32
    %c0_i32_0 = arith.constant 0 : i32
    %c0_i32_1 = arith.constant 0 : i32
    return %c0_i32, %c0_i32_0 : i32, i32
  }
  func.func @transform_12(%arg0: i32) -> (i32, i32) {
    %c0_i32 = arith.constant 0 : i32
    %c0_i32_0 = arith.constant 0 : i32
    %c0_i32_1 = arith.constant 0 : i32
    return %c0_i32, %c0_i32_0 : i32, i32
  }
  func.func @transform_13(%arg0: i32) -> (i32, i32, i32) {
    %c0_i32 = arith.constant 0 : i32
    %c0_i32_0 = arith.constant 0 : i32
    %c0_i32_1 = arith.constant 0 : i32
    %c0_i32_2 = arith.constant 0 : i32
    return %c0_i32, %c0_i32_0, %c0_i32_1 : i32, i32, i32
  }
  func.func @transform_14(%arg0: i32) -> (i32, i32) {
    %c0_i32 = arith.constant 0 : i32
    %c0_i32_0 = arith.constant 0 : i32
    %c0_i32_1 = arith.constant 0 : i32
    return %c0_i32, %c0_i32_0 : i32, i32
  }
  func.func @transform_15(%arg0: i32) -> (i32, i32) {
    %c0_i32 = arith.constant 0 : i32
    %c0_i32_0 = arith.constant 0 : i32
    %c0_i32_1 = arith.constant 0 : i32
    return %c0_i32, %c0_i32_0 : i32, i32
  }
  func.func @transform_16(%arg0: i32) -> (i32, i32) {
    %c0_i32 = arith.constant 0 : i32
    %c0_i32_0 = arith.constant 0 : i32
    %c0_i32_1 = arith.constant 0 : i32
    return %c0_i32, %c0_i32_0 : i32, i32
  }
  func.func @transform_17(%arg0: i32) -> (i32, i32) {
    %c0_i32 = arith.constant 0 : i32
    %c0_i32_0 = arith.constant 0 : i32
    %c0_i32_1 = arith.constant 0 : i32
    return %c0_i32, %c0_i32_0 : i32, i32
  }
  func.func @transform_18(%arg0: i32) -> (i32, i32, i32) {
    %c0_i32 = arith.constant 0 : i32
    %c0_i32_0 = arith.constant 0 : i32
    %c0_i32_1 = arith.constant 0 : i32
    return %arg0, %c0_i32, %c0_i32_0 : i32, i32, i32
  }
}

</mosaic_0001>

<bundles_post_ra>
// kernel: classifier_forward.1
= control target key start
LH: loop header
LB: loop body
LE: loop exit
PB: predicated region body
PF: predicated region fallthrough
CT: control target
= control target key end

     0   :  { %s3486_s0 = inlined_call_operand.vmem [shape: bf16[2,32,128], index: 0, kind: input, shape index: {}]   ;;  %s3487_s1 = inlined_call_operand.vmem [shape: bf16[3,16,32], index: 1, kind: input, shape index: {}]   ;;  %s3488_s2 = inlined_call_operand.vmem [shape: bf16[384,64], index: 2, kind: input, shape index: {}]   ;;  %s3489_s3 = inlined_call_operand.vmem [shape: f32[1,64], index: 3, kind: input, shape index: {}]   ;;  %s3490_s4 = inlined_call_operand.vmem [shape: bf16[3,8,16], index: 4, kind: input, shape index: {}]   ;;  %s3491_s5 = inlined_call_operand.vmem [shape: bf16[192,64], index: 5, kind: input, shape index: {}]   ;;  %s3492_s6 = inlined_call_operand.vmem [shape: f32[1,64], index: 6, kind: input, shape index: {}]   ;;  %s3493_s7 = inlined_call_operand.vmem [shape: bf16[3,4,8], index: 7, kind: input, shape index: {}]   ;;  %s3494_s8 = inlined_call_operand.vmem [shape: bf16[192,64], index: 8, kind: input, shape index: {}]   ;;  %s3495_s9 = inlined_call_operand.vmem [shape: f32[1,64], index: 9, kind: input, shape index: {}]   ;;  %s3496_s10 = inlined_call_operand.vmem [shape: bf16[3,2,4], index: 10, kind: input, shape index: {}]   ;;  %s3497_s11 = inlined_call_operand.vmem [shape: bf16[192,64], index: 11, kind: input, shape index: {}]   ;;  %s3498_s12 = inlined_call_operand.vmem [shape: f32[1,64], index: 12, kind: input, shape index: {}]   ;;  %s3499_s13 = inlined_call_operand.vmem [shape: bf16[3,1,2], index: 13, kind: input, shape index: {}]   ;;  %s3500_s14 = inlined_call_operand.vmem [shape: bf16[192,64], index: 14, kind: input, shape index: {}]   ;;  %s3501_s15 = inlined_call_operand.vmem [shape: f32[1,64], index: 15, kind: input, shape index: {}]   ;;  %s3502_s16 = inlined_call_operand.vmem [shape: bf16[64,10], index: 16, kind: input, shape index: {}]   ;;  %s3503_s17 = inlined_call_operand.vmem [shape: f32[1,10], index: 17, kind: input, shape index: {}]   ;;  %s3504_s18 = inlined_call_operand.hbm [shape: f32[2,1,10], index: 18, kind: output, shape index: {}]  }
   0x1   :  { %3517 = sst [smem:[#allocation12_spill]] %s3486_s0 }
   0x2   :  { %3518 = sst [smem:[#allocation13_spill]] %s3487_s1 }
   0x3   :  { %3519 = sst [smem:[#allocation14_spill]] %s3488_s2 }
   0x4   :  { %3520 = sst [smem:[#allocation15_spill]] %s3504_s18 }
   0x5   :  { %23 = vsyncpa [#allocation3], 0 }
   0x6   :  { %25 = vsyncpa [#allocation3 + $0x1], 0  ;;  %s2968_s27 = smov 0   ;;  %s2970_s28 = smov 0  }
   0x7   :  { %s2972_s29 = smov 0   ;;  %s2974_s30 = smov 0  }
   0x8 LB: > { %3521 = sst [smem:[#allocation5_spill]] %s2854_s27  ;;  %s2989_s0 = sadd.s32 4294967295, %s2866_s30   ;;  %s2866_s30 = sphi %s2974_s30, %s3539_s30   ;;  %s2862_s29 = sphi %s2972_s29, %s3541_s29   ;;  %s2858_s28 = sphi %s2970_s28, %s3543_s28   ;;  %s2854_s27 = sphi %s2968_s27, %s3542_s27  }
   0x9   : > { %3522 = sst [smem:[#allocation6_spill]] %s2862_s29  ;;  %s2358_s19 = sadd.s32 4294967294, %s2866_s30  }
   0xa   : > { %3523 = sst [smem:[#allocation7_spill]] %s2866_s30  ;;  %s2993_s1 = sadd.s32 1, %s2866_s30  }
   0xb   : > { %3524 = sst [smem:[#allocation8_spill]] %s2993_s1  ;;  %s421_s20 = sadd.s32 1, %s2862_s29 }
   0xc   : > { %s418_s21 = ssub.s32 %s2866_s30, %s2993_s1  ;;  %p431_p0 = scmp.ne.s32.totalorder %s2862_s29, %s2858_s28 }
   0xd   : > { %p419_p1 = scmp.eq.s32.totalorder %s418_s21, 0  ;;  %p432_p2 = scmp.eq.s32.totalorder %s2989_s0, 1 }
   0xe   : > { %p437_p3 = scmp.ne.s32.totalorder %s2858_s28, %s2854_s27  ;;  %p438_p4 = scmp.eq.s32.totalorder %s2358_s19, 1 }
   0xf   : > { %s3004_s22 = scalar_select %p419_p1, %s2862_s29, %s421_s20  }
  0x10   : > { %p3006_p5 = por %p432_p2, %p431_p0  ;;  %p3010_p6 = por %p438_p4, %p437_p3 }
  0x11   : > { %3525 = sst [smem:[#allocation9_spill]] %s3004_s22  ;;  %p2361_p7 = scmp.ge.s32.totalorder %s2866_s30, 1 }
  0x12   : > { %s3526_s2 = scalar_select %p3006_p5, 1, 0 }
  0x13   : > { %s3528_s23 = scalar_select %p3010_p6, 1, 0 }
  0x14   : > { %3527 = sst [smem:[#allocation10_spill]] %s3526_s2  ;;  %p515_p8 = scmp.lt.s32.totalorder %s2866_s30, 3 }
  0x15   : > { %3529 = sst [smem:[#allocation11_spill]] %s3528_s23 }
  0x16   : > { %p516_p9 = pnand %p2361_p7, %p515_p8 }
  0x17   : > { %p568_p10 = scmp.lt.s32.totalorder (!%p516_p9), %s2989_s0, 1  ;;  %s3530_s20 = sld [smem:[#allocation12_spill]] (!%p516_p9) }
  0x18   : > { %519 = sbr.rel (%p516_p9) target bundleno = 2739 (0xab3), region = 92  ;;  %s3531_s1 = sld [smem:[#allocation14_spill]] (!%p516_p9) }
  0x19   : > { %s3532_s30 = sld [smem:[#allocation13_spill]] (!%p516_p9)  ;;  %s2871_s19 = smov (!%p516_p9), 64  }
  0x1a   : > { %s566_s22 = sand.u32 (!%p516_p9), 1, %s2858_s28   ;;  %s2481_s23 = sshll.u32 (!%p516_p9), %s2989_s0, 4 }
  0x1b   : > { %s2291_s29 = scalar_lea.sflag (!%p516_p9), [#allocation3], %s566_s22  ;;  %s2872_s27 = smov (!%p516_p9), [#allocation2]  }
  0x1d   : > { %v2868_v0 = vmov 0.0   ;;  %s569_s24 = scalar_select %p568_p10, %s2989_s0, 1  ;;  %vm2869_vm0 = vmmov 0   ;;  %vm597_vm1 = vcmask 261120   ;;  %v2376_v48 = vld [vmem:[%s3489_s3] ss:$0 sm:$0xff] }
  0x1e   : > { %2554 = vmatprep.subr.bf16.mxu0 %v2868_v0  ;;  %2562 = vmatprep.subr.bf16.mxu1 %v2868_v0  ;;  %v2730_v3 = vld [vmem:[%s3531_s1 + $0x78] sm:$0xff]   ;;  %v2732_v7 = vld [vmem:[%s3531_s1 + $0x70] sm:$0xff]   ;;  %v2734_v10 = vld [vmem:[%s3531_s1 + $0x68] sm:$0xff]   ;;  %vm1034_vm2 = vcmask 130048   ;;  %vm1174_vm3 = vcmask 523264   ;;  %vm1332_vm4 = vcmask 1043456  }
  0x1f   : > { %2558 = vmatprep.mubr.msk.bf16.mxu0 %vm2869_vm0, %v2868_v0  ;;  %2566 = vmatprep.mubr.msk.bf16.mxu1 %vm2869_vm0, %v2868_v0  ;;  %s2484_s25 = sshll.u32 %s569_s24, 4  ;;  %s3533_s18 = smov %s3532_s30  ;;  %v2727_v4 = vld [vmem:[%s3532_s30] sm:$0xff]   ;;  %v2731_v6 = vld [vmem:[%s3531_s1 + $0x38] sm:$0xff]   ;;  %v2733_v9 = vld [vmem:[%s3531_s1 + $0x30] sm:$0xff]   ;;  %vm1328_vm5 = vcmask 64512   ;;  %vm1629_vm6 = vcmask 1041408  }
  0x20   : > { %s572_s21 = scalar_lea.vmem %s3530_s20, %s2484_s25  ;;  %v2728_v5 = vld [vmem:[%s3533_s18 + $0x8] sm:$0xff]   ;;  %v2729_v8 = vld [vmem:[%s3533_s18 + $0x10] sm:$0xff]   ;;  %v2735_v11 = vld [vmem:[%s3531_s1 + $0xb8] sm:$0xff]   ;;  %vm1625_vm7 = vcmask 31744   ;;  %vm1926_vm8 = vcmask 1040384   ;;  %vm1922_vm9 = vcmask 15360  }
  0x21   : > { %v2725_v1 = vld [vmem:[%s572_s21 + $0x8] sm:$0xff]   ;;  %v2726_v2 = vld [vmem:[%s572_s21] sm:$0xff]   ;;  %v2738_v14 = vld [vmem:[%s3531_s1 + $0xb0] sm:$0xff]   ;;  %s567_s20 = scalar_lea.vmem [#allocation2], %s566_s22  ;;  %vm2288_vm10 = vcmask 73728   ;;  %s3535_s25 = sld [smem:[#allocation15_spill]] }
  0x22   : > { %2555 = vmatpush3.bf16.msra.mxu0 %v2725_v1  ;;  %2563 = vmatpush3.bf16.msra.mxu1 %v2725_v1  ;;  %v2736_v12 = vld [vmem:[%s3531_s1 + $0x28] sm:$0xff]   ;;  %v2737_v13 = vld [vmem:[%s3531_s1 + $0x60] sm:$0xff]   ;;  %v2740_v16 = vld [vmem:[%s3531_s1 + $0x58] sm:$0xff]   ;;  %s2303_s21 = sshll.u32 %s567_s20, 4  ;;  %s2810_s30 = sshll.u32 %s2872_s27, 4  ;;  %s3447_s21 = int_to_ptr.vmem [resolvable:$true] %s2303_s21  ;;  %s2811_s30 = int_to_ptr.vmem [resolvable:$false] %s2810_s30 }
  0x23   : > { %2556 = vmatprep.subr.bf16.mxu0 %v2868_v0  ;;  %2564 = vmatprep.subr.bf16.mxu1 %v2868_v0  ;;  %v2739_v15 = vld [vmem:[%s3531_s1 + $0x20] sm:$0xff]   ;;  %v2741_v17 = vld [vmem:[%s3531_s1 + $0xa8] sm:$0xff]   ;;  %v2742_v18 = vld [vmem:[%s3531_s1 + $0x18] sm:$0xff]   ;;  %s2806_s0 = scalar_lea.vmem %s3447_s21, 16  ;;  %s2812_s24 = scalar_lea.vmem %s2811_s30, 32 }
  0x24   : > { %v2743_v19 = vld [vmem:[%s3531_s1 + $0x50] sm:$0xff]   ;;  %v2744_v20 = vld [vmem:[%s3531_s1 + $0xa0] sm:$0xff]   ;;  %v2746_v22 = vld [vmem:[%s3531_s1 + $0x48] sm:$0xff]   ;;  %p2807_p11 = scmp.ne.s32.totalorder %s3447_s21, %s2806_s0  ;;  %p2813_p0 = scmp.lt.s32.totalorder %s3447_s21, %s2811_s30 }
  0x25   : > { %v2745_v21 = vld [vmem:[%s3531_s1 + $0x10] sm:$0xff]   ;;  %v2747_v23 = vld [vmem:[%s3531_s1 + $0x98] sm:$0xff]   ;;  %v2748_v24 = vld [vmem:[%s3531_s1 + $0x8] sm:$0xff]   ;;  %p2814_p1 = scmp.lt.s32.totalorder %s2812_s24, %s2806_s0 }
  0x26   : > { %2557 = vmatpush3.bf16.msra.mxu0 %v2726_v2  ;;  %2565 = vmatpush3.bf16.msra.mxu1 %v2726_v2  ;;  %v2749_v25 = vld [vmem:[%s3531_s1 + $0x40] sm:$0xff]   ;;  %v2750_v26 = vld [vmem:[%s3531_s1 + $0x90] sm:$0xff]   ;;  %v2752_v28 = vld [vmem:[%s3531_s1 + $0x88] sm:$0xff]   ;;  %p2808_p12 = pnand %p2807_p11, %p3006_p5 }
  0x27   : > { %2570 = vmatprep.subr.bf16.mxu0 %v2868_v0  ;;  %2494 = vmatprep.subr.bf16.mxu1 %v2730_v3  ;;  %v2751_v27 = vld [vmem:[%s3531_s1] sm:$0xff]   ;;  %v2754_v3 = vld [vmem:[%s3491_s5 + $0x38] sm:$0xff]   ;;  %s3445_s26 = scalar_lea.hbm %s3535_s25, %s2481_s23  ;;  %p2815_p2 = por %p2814_p1, %p2813_p0 }
  0x28   : > { %v2753_v29 = vld [vmem:[%s3531_s1 + $0x80] sm:$0xff]   ;;  %p2809_p13 = pneg %p2808_p12 }
  0x29   : > { %2559 = vmatmul.mubr.msk.bf16.vlgmr.msra.gmra.mxu0 %vm597_vm1, %v2727_v4  ;;  %2567 = vmatmul.mubr.msk.bf16.vlgmr.msra.gmra.mxu1 %vm597_vm1, %v2728_v5  ;;  %v2402_v63 = vld [vmem:[%s3490_s4 + $0x4] sm:$0xf]  ;;  %v2870_v4 = vmov 0   ;;  %v2755_v5 = vld [vmem:[%s3491_s5 + $0x30] sm:$0xff]  }
  0x2a   : > { %2571 = vmatpush3.bf16.msra.mxu0 %v2725_v1  ;;  %2574 = vmatprep.mubr.msk.bf16.mxu0 %vm2869_vm0, %v2868_v0  ;;  %v1033_v1 = vld [vmem:[%s3490_s4] sm:$0xf]  ;;  %p2816_p3 = pnand %p2815_p2, %p2809_p13 }
  0x2b   : > { %2572 = vmatprep.subr.bf16.mxu0 %v2868_v0  ;;  %2495 = vmatpush3.bf16.msra.mxu1 %v2731_v6  ;;  %v2756_v6 = vld [vmem:[%s3491_s5 + $0x28] sm:$0xff]  }
  0x2c   : > { %2496 = vmatprep.subr.bf16.mxu1 %v2732_v7  ;;  %v2757_v7 = vld [vmem:[%s3491_s5 + $0x20] sm:$0xff]  }
  0x2e   : > { %2573 = vmatpush3.bf16.msra.mxu0 %v2726_v2  ;;  %v2404_v2 = vld [vmem:[%s3490_s4 + $0x8] sm:$0xf] }
  0x2f   : > { %2497 = vmatpush3.bf16.msra.mxu1 %v2733_v9  ;;  %2578 = vmatprep.subr.bf16.mxu0 %v2868_v0  ;;  %v2759_v9 = vld [vmem:[%s3491_s5 + $0x10] sm:$0xff]  }
  0x30   : > { %2498 = vmatprep.subr.bf16.mxu1 %v2734_v10  ;;  %v2760_v10 = vld [vmem:[%s3491_s5 + $0x8] sm:$0xff]  }
  0x31   : > { %2575 = vmatmul.mubr.msk.bf16.vlgmr.msra.gmra.mxu0 %vm597_vm1, %v2729_v8  ;;  %v2758_v8 = vld [vmem:[%s3491_s5 + $0x18] sm:$0xff]  }
  0x32   : > { %2579 = vmatpush3.bf16.msra.mxu0 %v2735_v11  ;;  %2594 = vmatprep.mubr.msk.bf16.mxu0 %vm2869_vm0, %v2868_v0  ;;  %v2761_v11 = vld [vmem:[%s3491_s5] sm:$0xff]  }
  0x33   : > { %2499 = vmatpush3.bf16.msra.mxu1 %v2736_v12  ;;  %2580 = vmatprep.subr.bf16.mxu0 %v2868_v0  ;;  %v2762_v12 = vld [vmem:[%s3491_s5 + $0x58] sm:$0xff]  }
  0x34   : > { %2500 = vmatprep.subr.bf16.mxu1 %v2737_v13  ;;  %v2763_v13 = vld [vmem:[%s3491_s5 + $0x50] sm:$0xff]  }
  0x36   : > { %2581 = vmatpush3.bf16.msra.mxu0 %v2738_v14  ;;  %v2764_v14 = vld [vmem:[%s3491_s5 + $0x48] sm:$0xff]  }
  0x37   : > { %2501 = vmatpush3.bf16.msra.mxu1 %v2739_v15  ;;  %2582 = vmatprep.subr.bf16.mxu0 %v2868_v0  ;;  %v2765_v15 = vld [vmem:[%s3491_s5 + $0x40] sm:$0xff]  }
  0x38   : > { %2502 = vmatprep.subr.bf16.mxu1 %v2740_v16 }
  0x3a   : > { %2583 = vmatpush3.bf16.msra.mxu0 %v2741_v17 }
  0x3b   : > { %2503 = vmatpush3.bf16.msra.mxu1 %v2742_v18  ;;  %2584 = vmatprep.subr.bf16.mxu0 %v2868_v0 }
  0x3c   : > { %2504 = vmatprep.subr.bf16.mxu1 %v2743_v19 }
  0x3e   : > { %2585 = vmatpush3.bf16.msra.mxu0 %v2744_v20 }
  0x3f   : > { %2505 = vmatpush3.bf16.msra.mxu1 %v2745_v21  ;;  %2586 = vmatprep.subr.bf16.mxu0 %v2868_v0 }
  0x40   : > { %2506 = vmatprep.subr.bf16.mxu1 %v2746_v22 }
  0x42   : > { %2587 = vmatpush3.bf16.msra.mxu0 %v2747_v23 }
  0x43   : > { %2507 = vmatpush3.bf16.msra.mxu1 %v2748_v24  ;;  %2588 = vmatprep.subr.bf16.mxu0 %v2868_v0 }
  0x44   : > { %2508 = vmatprep.subr.bf16.mxu1 %v2749_v25 }
  0x46   : > { %2589 = vmatpush3.bf16.msra.mxu0 %v2750_v26 }
  0x47   : > { %2509 = vmatpush3.bf16.msra.mxu1 %v2751_v27  ;;  %2590 = vmatprep.subr.bf16.mxu0 %v2868_v0 }
  0x48   : > { %2598 = vmatprep.subr.bf16.mxu1 %v2868_v0 }
  0x4a   : > { %2591 = vmatpush3.bf16.msra.mxu0 %v2752_v28 }
  0x4b   : > { %2592 = vmatprep.subr.bf16.mxu0 %v2868_v0 }
  0x4e   : > { %2593 = vmatpush3.bf16.msra.mxu0 %v2753_v29 }
  0x4f   : > { %2604 = vmatprep.subr.bf16.mxu0 %v2868_v0 }
  0xe9   : > { %v635_v30 = vpop.f32.mrf.mxu0  ;;  %v688_v31 = vpop.f32.mrf.mxu1 }
  0xeb   : > { %v2560_v32 = vpop.f32.mrf.mxu0  ;;  %v2568_v33 = vpop.f32.mrf.mxu1 }
  0xec   : > { %v2406_v33 = vld [vmem:[%s3492_s6] ss:$0 sm:$0xff] }
  0xed   : > { %v638_v34 = vpop.f32.mrf.mxu0  ;;  %v691_v35 = vpop.f32.mrf.mxu1 }
  0xee   : > { %v642_v36 = vpack.c.bf16 %v638_v34, %v635_v30  ;;  %v695_v37 = vpack.c.bf16 %v691_v35, %v688_v31 }
  0xef   : > { %v2561_v38 = vpop.f32.mrf.mxu0  ;;  %v2569_v39 = vpop.f32.mrf.mxu1 }
  0xf0   : > { %980 = vmatprep.mubr.bf16.mxu1 %v695_v37 }
  0xf1   : > { %v741_v40 = vpop.f32.mrf.mxu0  ;;  %981 = vmatmul.mubr.bf16.vlgmr.msra.gmra.mxu1 %v642_v36 }
  0xf2   : > { %2600 = vmatprep.mubr.msk.bf16.mxu1 %vm2869_vm0, %v2868_v0 }
  0xf3   : > { %v2576_v41 = vpop.f32.mrf.mxu0 }
  0xf5   : > { %v744_v42 = vpop.f32.mrf.mxu0 }
  0xf6   : > { %v748_v43 = vpack.c.bf16 %v744_v42, %v741_v40  ;;  %v1327_v42 = vld [vmem:[%s3493_s7] sm:$0x3] }
  0xf7   : > { %v2577_v44 = vpop.f32.mrf.mxu0 }
  0xf8   : > { %2595 = vmatmul.mubr.bf16.vlgmr.msra.gmra.mxu0 %v748_v43  ;;  %v2421_v43 = vld [vmem:[%s3493_s7 + $0x2] sm:$0x3]  ;;  %v2423_v44 = vld [vmem:[%s3493_s7 + $0x4] sm:$0x3] }
  0xf9   : > { %2606 = vmatprep.mubr.msk.bf16.mxu0 %vm2869_vm0, %v2868_v0 }
 0x1b1   : > { %v2510_v45 = vpop.f32.mrf.mxu1 }
 0x1b3   : > { %v2511_v46 = vpop.f32.mrf.mxu1 }
 0x1b4   : > { %v2512_v47 = vadd.f32 %v2511_v46, %v2510_v45  ;;  %v2766_v45 = vld [vmem:[%s3494_s8 + $0x38] sm:$0xff]   ;;  %v2767_v46 = vld [vmem:[%s3494_s8 + $0x30] sm:$0xff]  }
 0x1b5   : > { %v2513_v49 = vpop.f32.mrf.mxu1 }
 0x1b6   : > { %v983_v51 = vadd.f32 %v2512_v47, %v2376_v48  ;;  %v2768_v47 = vld [vmem:[%s3494_s8 + $0x28] sm:$0xff]  }
 0x1b7   : > { %v2514_v50 = vpop.f32.mrf.mxu1 }
 0x1b8   : > { %v2515_v52 = vadd.f32 %v2514_v50, %v2513_v49  ;;  %v1023_v53 = vpop.f32.mrf.mxu0  ;;  %v2770_v49 = vld [vmem:[%s3494_s8 + $0x18] sm:$0xff]   ;;  %v2771_v50 = vld [vmem:[%s3494_s8 + $0x10] sm:$0xff]  }
 0x1b9   : > { %v1024_v56 = vadd.f32 %v1023_v53, %v983_v51  ;;  %v2772_v51 = vld [vmem:[%s3494_s8 + $0x8] sm:$0xff]   ;;  %v2774_v53 = vld [vmem:[%s3494_s8 + $0x58] sm:$0xff]  }
 0x1ba   : > { %v2596_v54 = vpop.f32.mrf.mxu0  ;;  %v986_v55 = vadd.f32 %v2515_v52, %v2376_v48  ;;  %v2769_v48 = vld [vmem:[%s3494_s8 + $0x20] sm:$0xff]  }
 0x1bb   : > { %v1030_v60 = vmax.f32 %v1024_v56, 0.0  ;;  %v2773_v52 = vld [vmem:[%s3494_s8] sm:$0xff]   ;;  %v2775_v54 = vld [vmem:[%s3494_s8 + $0x50] sm:$0xff]  }
 0x1bc   : > { %v1026_v57 = vpop.f32.mrf.mxu0  ;;  %v2777_v56 = vld [vmem:[%s3494_s8 + $0x40] sm:$0xff]  }
 0x1bd   : > { %v1027_v58 = vadd.f32 %v1026_v57, %v986_v55  ;;  %v2776_v55 = vld [vmem:[%s3494_s8 + $0x48] sm:$0xff]  }
 0x1be   : > { %v2597_v59 = vpop.f32.mrf.mxu0 }
 0x1bf   : > { %v1031_v61 = vmax.f32 %v1027_v58, 0.0 }
 0x1c1   : > { %v1032_v62 = vpack.c.bf16 %v1031_v61, %v1030_v60 }
 0x1c3   : > { %2599 = vmatpush3.bf16.msra.mxu1 %v1032_v62  ;;  %2605 = vmatpush3.bf16.msra.mxu0 %v1032_v62 }
 0x1c4   : > { %2610 = vmatprep.subr.bf16.mxu1 %v2868_v0  ;;  %1285 = vmatprep.subr.bf16.mxu0 %v2870_v4 }
 0x1c6   : > { %2607 = vmatmul.mubr.msk.bf16.vlgmr.msra.gmra.mxu0 %vm1034_vm2, %v2402_v63  ;;  %2601 = vmatmul.mubr.msk.bf16.vlgmr.msra.gmra.mxu1 %vm1034_vm2, %v1033_v1 }
 0x1c7   : > { %2611 = vmatpush3.bf16.msra.mxu1 %v1032_v62  ;;  %2612 = vmatprep.mubr.msk.bf16.mxu1 %vm2869_vm0, %v2868_v0 }
 0x1c8   : > { %2616 = vmatprep.subr.bf16.mxu1 %v2868_v0  ;;  %1286 = vmatpush1.bf16.msra.mxu0 %v2754_v3 }
 0x1c9   : > { %1287 = vmatprep.subr.bf16.mxu0 %v2870_v4 }
 0x1cc   : > { %1288 = vmatpush1.bf16.msra.mxu0 %v2755_v5 }
 0x1cd   : > { %1289 = vmatprep.subr.bf16.mxu0 %v2870_v4 }
 0x1ce   : > { %2613 = vmatmul.mubr.msk.bf16.vlgmr.msra.gmra.mxu1 %vm1034_vm2, %v2404_v2 }
 0x1cf   : > { %2618 = vmatprep.mubr.msk.bf16.mxu1 %vm2869_vm0, %v2868_v0 }
 0x1d0   : > { %1290 = vmatpush1.bf16.msra.mxu0 %v2756_v6 }
 0x1d1   : > { %1291 = vmatprep.subr.bf16.mxu0 %v2870_v4 }
 0x1d4   : > { %1292 = vmatpush1.bf16.msra.mxu0 %v2757_v7 }
 0x1d5   : > { %1293 = vmatprep.subr.bf16.mxu0 %v2870_v4 }
 0x1d8   : > { %1294 = vmatpush1.bf16.msra.mxu0 %v2758_v8 }
 0x1d9   : > { %1295 = vmatprep.subr.bf16.mxu0 %v2870_v4 }
 0x1dc   : > { %1296 = vmatpush1.bf16.msra.mxu0 %v2759_v9 }
 0x1dd   : > { %1297 = vmatprep.subr.bf16.mxu0 %v2870_v4 }
 0x1e0   : > { %1298 = vmatpush1.bf16.msra.mxu0 %v2760_v10 }
 0x1e1   : > { %1299 = vmatprep.subr.bf16.mxu0 %v2870_v4 }
 0x1e4   : > { %1300 = vmatpush1.bf16.msra.mxu0 %v2761_v11 }
 0x1e5   : > { %1309 = vmatprep.subr.bf16.mxu0 %v2870_v4 }
 0x1e8   : > { %1310 = vmatpush2.bf16.msra.mxu0 %v2762_v12  ;;  %v2425_v12 = vld [vmem:[%s3495_s9] ss:$0 sm:$0xff] }
 0x1e9   : > { %1311 = vmatprep.subr.bf16.mxu0 %v2870_v4 }
 0x1ec   : > { %1312 = vmatpush2.bf16.msra.mxu0 %v2763_v13 }
 0x1ed   : > { %1313 = vmatprep.subr.bf16.mxu0 %v2870_v4 }
 0x1f0   : > { %1314 = vmatpush2.bf16.msra.mxu0 %v2764_v14 }
 0x1f1   : > { %1315 = vmatprep.subr.bf16.mxu0 %v2870_v4 }
 0x1f4   : > { %1316 = vmatpush2.bf16.msra.mxu0 %v2765_v15 }
 0x1f5   : > { %2634 = vmatprep.subr.bf16.mxu0 %v2868_v0 }
 0x286   : > { %v1118_v16 = vpop.f32.mrf.mxu0  ;;  %v1072_v17 = vpop.f32.mrf.mxu1 }
 0x287   : > { %v1124_v18 = vpack.c.bf16 %v1118_v16, %v1118_v16  ;;  %v1078_v30 = vpack.c.bf16 %v1072_v17, %v1072_v17 }
 0x288   : > { %v2608_v19 = vpop.f32.mrf.mxu0  ;;  %v2602_v20 = vpop.f32.mrf.mxu1 }
 0x289   : > { %1172 = vrot.lane.b32.xlu0 %v1124_v18, %s2871_s19 }
 0x28a   : > { %v1121_v21 = vpop.f32.mrf.mxu0  ;;  %v1075_v22 = vpop.f32.mrf.mxu1 }
 0x28b   : > { %v1624_v21 = vld [vmem:[%s3496_s10] sm:$0x1]  ;;  %v2440_v22 = vld [vmem:[%s3496_s10 + $0x1] sm:$0x1] }
 0x28c   : > { %v2609_v23 = vpop.f32.mrf.mxu0  ;;  %v2603_v24 = vpop.f32.mrf.mxu1 }
 0x28d   : > { %v2442_v23 = vld [vmem:[%s3496_s10 + $0x2] sm:$0x1]  ;;  %v2778_v24 = vld [vmem:[%s3497_s11 + $0x38] sm:$0xff]  }
 0x28e   : > { %v1164_v25 = vpop.f32.mrf.mxu1 }
 0x28f   : > { %v1170_v26 = vpack.c.bf16 %v1164_v25, %v1164_v25  ;;  %v2779_v25 = vld [vmem:[%s3497_s11 + $0x30] sm:$0xff]  }
 0x290   : > { %v2614_v27 = vpop.f32.mrf.mxu1 }
 0x291   : > { %2419 = vmatprep.mubr.msk.bf16.mxu0 %vm1174_vm3, %v1170_v26  ;;  %v2780_v26 = vld [vmem:[%s3497_s11 + $0x28] sm:$0xff]   ;;  %v2781_v27 = vld [vmem:[%s3497_s11 + $0x20] sm:$0xff]  }
 0x292   : > { %v1167_v28 = vpop.f32.mrf.mxu1 }
 0x293   : > { %v2782_v28 = vld [vmem:[%s3497_s11 + $0x18] sm:$0xff]  }
 0x294   : > { %v2615_v29 = vpop.f32.mrf.mxu1 }
 0x295   : > { %v2783_v29 = vld [vmem:[%s3497_s11 + $0x10] sm:$0xff]  }
 0x2fb   : > { %v1173_v31 = vpop.permute.xlu0 %1172 }
 0x2fc   : > { %v1177_v32 = vsel %vm1174_vm3, %v1078_v30, %v1173_v31  ;;  %v2784_v30 = vld [vmem:[%s3497_s11 + $0x8] sm:$0xff]   ;;  %v2785_v31 = vld [vmem:[%s3497_s11] sm:$0xff]  }
 0x2fd   : > { %1318 = vmatmul.mubr.bf16.vlgmr.msra.gmra.mxu0 %v1177_v32  ;;  %v2786_v32 = vld [vmem:[%s3497_s11 + $0x58] sm:$0xff]  }
 0x2fe   : > { %2636 = vmatprep.mubr.msk.bf16.mxu0 %vm2869_vm0, %v2868_v0 }
 0x3bd   : > { %v1319_v34 = vpop.f32.mrf.mxu0 }
 0x3be   : > { %v1320_v35 = vadd.f32 %v2406_v33, %v1319_v34  ;;  %v2787_v33 = vld [vmem:[%s3497_s11 + $0x50] sm:$0xff]   ;;  %v2788_v34 = vld [vmem:[%s3497_s11 + $0x48] sm:$0xff]  }
 0x3bf   : > { %v1321_v36 = vpop.f32.mrf.mxu0 }
 0x3c0   : > { %v1325_v37 = vmax.f32 %v1320_v35, 0.0  ;;  %v2789_v35 = vld [vmem:[%s3497_s11 + $0x40] sm:$0xff]  }
 0x3c1   : > { %v1322_v38 = vpop.f32.mrf.mxu0 }
 0x3c2   : > { %v1326_v39 = vpack.c.bf16 %v1325_v37, %v1325_v37 }
 0x3c3   : > { %v1323_v40 = vpop.f32.mrf.mxu0 }
 0x3c4   : > { %v1334_v41 = vsel %vm1332_vm4, %v1326_v39, 0 }
 0x3c5   : > { %2617 = vmatpush3.bf16.msra.mxu1 %v1334_v41 }
 0x3c6   : > { %2622 = vmatprep.subr.bf16.mxu1 %v2868_v0 }
 0x3c8   : > { %2619 = vmatmul.mubr.msk.bf16.vlgmr.msra.gmra.mxu1 %vm1328_vm5, %v1327_v42 }
 0x3c9   : > { %2623 = vmatpush3.bf16.msra.mxu1 %v1334_v41  ;;  %2624 = vmatprep.mubr.msk.bf16.mxu1 %vm2869_vm0, %v2868_v0 }
 0x3ca   : > { %2628 = vmatprep.subr.bf16.mxu1 %v2868_v0 }
 0x3d0   : > { %2625 = vmatmul.mubr.msk.bf16.vlgmr.msra.gmra.mxu1 %vm1328_vm5, %v2421_v43 }
 0x3d1   : > { %2629 = vmatpush3.bf16.msra.mxu1 %v1334_v41  ;;  %2630 = vmatprep.mubr.msk.bf16.mxu1 %vm2869_vm0, %v2868_v0 }
 0x3d2   : > { %1582 = vmatprep.subr.bf16.mxu1 %v2870_v4 }
 0x3d8   : > { %2631 = vmatmul.mubr.msk.bf16.vlgmr.msra.gmra.mxu1 %vm1328_vm5, %v2423_v44 }
 0x3d9   : > { %1583 = vmatpush1.bf16.msra.mxu1 %v2766_v45 }
 0x3da   : > { %1584 = vmatprep.subr.bf16.mxu1 %v2870_v4 }
 0x3dd   : > { %1585 = vmatpush1.bf16.msra.mxu1 %v2767_v46 }
 0x3de   : > { %1586 = vmatprep.subr.bf16.mxu1 %v2870_v4 }
 0x3e1   : > { %1587 = vmatpush1.bf16.msra.mxu1 %v2768_v47 }
 0x3e2   : > { %1588 = vmatprep.subr.bf16.mxu1 %v2870_v4 }
 0x3e5   : > { %1589 = vmatpush1.bf16.msra.mxu1 %v2769_v48 }
 0x3e6   : > { %1590 = vmatprep.subr.bf16.mxu1 %v2870_v4 }
 0x3e9   : > { %1591 = vmatpush1.bf16.msra.mxu1 %v2770_v49 }
 0x3ea   : > { %1592 = vmatprep.subr.bf16.mxu1 %v2870_v4 }
 0x3ed   : > { %1593 = vmatpush1.bf16.msra.mxu1 %v2771_v50 }
 0x3ee   : > { %1594 = vmatprep.subr.bf16.mxu1 %v2870_v4 }
 0x3f1   : > { %1595 = vmatpush1.bf16.msra.mxu1 %v2772_v51 }
 0x3f2   : > { %1596 = vmatprep.subr.bf16.mxu1 %v2870_v4 }
 0x3f5   : > { %1597 = vmatpush1.bf16.msra.mxu1 %v2773_v52 }
 0x3f6   : > { %1606 = vmatprep.subr.bf16.mxu1 %v2870_v4 }
 0x3f9   : > { %1607 = vmatpush2.bf16.msra.mxu1 %v2774_v53  ;;  %v2444_v53 = vld [vmem:[%s3498_s12] ss:$0 sm:$0xff] }
 0x3fa   : > { %1608 = vmatprep.subr.bf16.mxu1 %v2870_v4 }
 0x3fd   : > { %1609 = vmatpush2.bf16.msra.mxu1 %v2775_v54 }
 0x3fe   : > { %1610 = vmatprep.subr.bf16.mxu1 %v2870_v4 }
 0x401   : > { %1611 = vmatpush2.bf16.msra.mxu1 %v2776_v55 }
 0x402   : > { %1612 = vmatprep.subr.bf16.mxu1 %v2870_v4 }
 0x405   : > { %1613 = vmatpush2.bf16.msra.mxu1 %v2777_v56 }
 0x406   : > { %2652 = vmatprep.subr.bf16.mxu1 %v2868_v0 }
 0x488   : > { %v1370_v57 = vpop.f32.mrf.mxu1 }
 0x489   : > { %v1376_v9 = vpack.c.bf16 %v1370_v57, %v1370_v57 }
 0x48a   : > { %v2620_v58 = vpop.f32.mrf.mxu1 }
 0x48c   : > { %v1373_v59 = vpop.f32.mrf.mxu1 }
 0x48e   : > { %v2621_v60 = vpop.f32.mrf.mxu1 }
 0x490   : > { %v1416_v61 = vpop.f32.mrf.mxu1 }
 0x491   : > { %v1422_v62 = vpack.c.bf16 %v1416_v61, %v1416_v61 }
 0x492   : > { %v2626_v63 = vpop.f32.mrf.mxu1 }
 0x493   : > { %1470 = vrot.lane.b32.xlu0 %v1422_v62, %s2871_s19  ;;  %v1921_v62 = vld [vmem:[%s3499_s13] sm:$0x1]  ;;  %v2459_v63 = vld [vmem:[%s3499_s13 + $0x1] sm:$0x1] }
 0x494   : > { %v1419_v1 = vpop.f32.mrf.mxu1 }
 0x495   : > { %v2461_v1 = vld [vmem:[%s3499_s13 + $0x2] sm:$0x1] }
 0x496   : > { %v2627_v2 = vpop.f32.mrf.mxu1 }
 0x497   : > { %v2790_v2 = vld [vmem:[%s3500_s14 + $0x38] sm:$0xff]  }
 0x498   : > { %v1462_v3 = vpop.f32.mrf.mxu1 }
 0x499   : > { %v1468_v5 = vpack.c.bf16 %v1462_v3, %v1462_v3  ;;  %v2791_v3 = vld [vmem:[%s3500_s14 + $0x30] sm:$0xff]  }
 0x49a   : > { %v2632_v6 = vpop.f32.mrf.mxu1 }
 0x49b   : > { %2438 = vmatprep.mubr.msk.bf16.mxu1 %vm1174_vm3, %v1468_v5  ;;  %v2792_v5 = vld [vmem:[%s3500_s14 + $0x28] sm:$0xff]   ;;  %v2793_v6 = vld [vmem:[%s3500_s14 + $0x20] sm:$0xff]  }
 0x49c   : > { %v1465_v7 = vpop.f32.mrf.mxu1 }
 0x49d   : > { %v2794_v7 = vld [vmem:[%s3500_s14 + $0x18] sm:$0xff]  }
 0x49e   : > { %v2633_v8 = vpop.f32.mrf.mxu1 }
 0x49f   : > { %v2795_v8 = vld [vmem:[%s3500_s14 + $0x10] sm:$0xff]  }
 0x505   : > { %v1471_v10 = vpop.permute.xlu0 %1470 }
 0x506   : > { %v1474_v11 = vsel %vm1174_vm3, %v1376_v9, %v1471_v10  ;;  %v2796_v9 = vld [vmem:[%s3500_s14 + $0x8] sm:$0xff]   ;;  %v2797_v10 = vld [vmem:[%s3500_s14] sm:$0xff]  }
 0x507   : > { %1615 = vmatmul.mubr.bf16.vlgmr.msra.gmra.mxu1 %v1474_v11  ;;  %v2798_v11 = vld [vmem:[%s3500_s14 + $0x58] sm:$0xff]  }
 0x508   : > { %2654 = vmatprep.mubr.msk.bf16.mxu1 %vm2869_vm0, %v2868_v0 }
 0x5c7   : > { %v1616_v13 = vpop.f32.mrf.mxu1 }
 0x5c8   : > { %v1617_v14 = vadd.f32 %v2425_v12, %v1616_v13  ;;  %v2799_v12 = vld [vmem:[%s3500_s14 + $0x50] sm:$0xff]   ;;  %v2800_v13 = vld [vmem:[%s3500_s14 + $0x48] sm:$0xff]  }
 0x5c9   : > { %v1618_v15 = vpop.f32.mrf.mxu1 }
 0x5ca   : > { %v1622_v16 = vmax.f32 %v1617_v14, 0.0  ;;  %v2801_v14 = vld [vmem:[%s3500_s14 + $0x40] sm:$0xff]   ;;  %v2802_v15 = vld [vmem:[%s3502_s16 + $0x18] sm:$0xff]  }
 0x5cb   : > { %v1619_v17 = vpop.f32.mrf.mxu1 }
 0x5cc   : > { %v1623_v18 = vpack.c.bf16 %v1622_v16, %v1622_v16  ;;  %v2803_v17 = vld [vmem:[%s3502_s16 + $0x10] sm:$0xff]  }
 0x5cd   : > { %v1620_v19 = vpop.f32.mrf.mxu1 }
 0x5ce   : > { %v1631_v20 = vsel %vm1629_vm6, %v1623_v18, 0 }
 0x5cf   : > { %2635 = vmatpush3.bf16.msra.mxu0 %v1631_v20 }
 0x5d0   : > { %2640 = vmatprep.subr.bf16.mxu0 %v2868_v0 }
 0x5d2   : > { %2637 = vmatmul.mubr.msk.bf16.vlgmr.msra.gmra.mxu0 %vm1625_vm7, %v1624_v21 }
 0x5d3   : > { %2641 = vmatpush3.bf16.msra.mxu0 %v1631_v20  ;;  %2642 = vmatprep.mubr.msk.bf16.mxu0 %vm2869_vm0, %v2868_v0 }
 0x5d4   : > { %2646 = vmatprep.subr.bf16.mxu0 %v2868_v0 }
 0x5da   : > { %2643 = vmatmul.mubr.msk.bf16.vlgmr.msra.gmra.mxu0 %vm1625_vm7, %v2440_v22 }
 0x5db   : > { %2647 = vmatpush3.bf16.msra.mxu0 %v1631_v20  ;;  %2648 = vmatprep.mubr.msk.bf16.mxu0 %vm2869_vm0, %v2868_v0 }
 0x5dc   : > { %1879 = vmatprep.subr.bf16.mxu0 %v2870_v4 }
 0x5e2   : > { %2649 = vmatmul.mubr.msk.bf16.vlgmr.msra.gmra.mxu0 %vm1625_vm7, %v2442_v23 }
 0x5e3   : > { %1880 = vmatpush1.bf16.msra.mxu0 %v2778_v24 }
 0x5e4   : > { %1881 = vmatprep.subr.bf16.mxu0 %v2870_v4 }
 0x5e7   : > { %1882 = vmatpush1.bf16.msra.mxu0 %v2779_v25 }
 0x5e8   : > { %1883 = vmatprep.subr.bf16.mxu0 %v2870_v4 }
 0x5eb   : > { %1884 = vmatpush1.bf16.msra.mxu0 %v2780_v26 }
 0x5ec   : > { %1885 = vmatprep.subr.bf16.mxu0 %v2870_v4 }
 0x5ef   : > { %1886 = vmatpush1.bf16.msra.mxu0 %v2781_v27 }
 0x5f0   : > { %1887 = vmatprep.subr.bf16.mxu0 %v2870_v4 }
 0x5f3   : > { %1888 = vmatpush1.bf16.msra.mxu0 %v2782_v28 }
 0x5f4   : > { %1889 = vmatprep.subr.bf16.mxu0 %v2870_v4 }
 0x5f7   : > { %1890 = vmatpush1.bf16.msra.mxu0 %v2783_v29 }
 0x5f8   : > { %1891 = vmatprep.subr.bf16.mxu0 %v2870_v4 }
 0x5fb   : > { %1892 = vmatpush1.bf16.msra.mxu0 %v2784_v30 }
 0x5fc   : > { %1893 = vmatprep.subr.bf16.mxu0 %v2870_v4 }
 0x5ff   : > { %1894 = vmatpush1.bf16.msra.mxu0 %v2785_v31 }
 0x600   : > { %1903 = vmatprep.subr.bf16.mxu0 %v2870_v4 }
 0x603   : > { %1904 = vmatpush2.bf16.msra.mxu0 %v2786_v32 }
 0x604   : > { %1905 = vmatprep.subr.bf16.mxu0 %v2870_v4 }
 0x607   : > { %1906 = vmatpush2.bf16.msra.mxu0 %v2787_v33  ;;  %v2804_v33 = vld [vmem:[%s3502_s16 + $0x8] sm:$0xff]  }
 0x608   : > { %1907 = vmatprep.subr.bf16.mxu0 %v2870_v4 }
 0x60b   : > { %1908 = vmatpush2.bf16.msra.mxu0 %v2788_v34  ;;  %v2805_v34 = vld [vmem:[%s3502_s16] sm:$0xff]  }
 0x60c   : > { %1909 = vmatprep.subr.bf16.mxu0 %v2870_v4 }
 0x60f   : > { %1910 = vmatpush2.bf16.msra.mxu0 %v2789_v35  ;;  %v2094_v35 = vld [vmem:[%s3501_s15] sm:$0x1] }
 0x610   : > { %2670 = vmatprep.subr.bf16.mxu0 %v2868_v0 }
 0x692   : > { %v1667_v36 = vpop.f32.mrf.mxu0 }
 0x693   : > { %v1673_v50 = vpack.c.bf16 %v1667_v36, %v1667_v36 }
 0x694   : > { %v2638_v37 = vpop.f32.mrf.mxu0 }
 0x696   : > { %v1670_v38 = vpop.f32.mrf.mxu0 }
 0x698   : > { %v2639_v39 = vpop.f32.mrf.mxu0 }
 0x69a   : > { %v1713_v40 = vpop.f32.mrf.mxu0 }
 0x69b   : > { %v1719_v41 = vpack.c.bf16 %v1713_v40, %v1713_v40 }
 0x69c   : > { %v2644_v42 = vpop.f32.mrf.mxu0 }
 0x69d   : > { %1767 = vrot.lane.b32.xlu1 %v1719_v41, %s2871_s19 }
 0x69e   : > { %v1716_v43 = vpop.f32.mrf.mxu0 }
 0x6a0   : > { %v2645_v44 = vpop.f32.mrf.mxu0 }
 0x6a2   : > { %v1759_v45 = vpop.f32.mrf.mxu0 }
 0x6a3   : > { %v1765_v46 = vpack.c.bf16 %v1759_v45, %v1759_v45 }
 0x6a4   : > { %v2650_v47 = vpop.f32.mrf.mxu0 }
 0x6a5   : > { %2457 = vmatprep.mubr.msk.bf16.mxu0 %vm1174_vm3, %v1765_v46 }
 0x6a6   : > { %v1762_v48 = vpop.f32.mrf.mxu0 }
 0x6a8   : > { %v2651_v49 = vpop.f32.mrf.mxu0 }
 0x70f   : > { %v1768_v51 = vpop.permute.xlu1 %1767 }
 0x710   : > { %v1771_v52 = vsel %vm1174_vm3, %v1673_v50, %v1768_v51 }
 0x711   : > { %1912 = vmatmul.mubr.bf16.vlgmr.msra.gmra.mxu0 %v1771_v52 }
 0x712   : > { %2678 = vmatprep.mubr.msk.bf16.mxu0 %vm2869_vm0, %v2868_v0  ;;  %2671 = vmatpush3.bf16.msra.mxu0 %v2802_v15 }
 0x713   : > { %2672 = vmatprep.subr.bf16.mxu0 %v2868_v0 }
 0x716   : > { %2673 = vmatpush3.bf16.msra.mxu0 %v2803_v17 }
 0x717   : > { %2674 = vmatprep.subr.bf16.mxu0 %v2868_v0 }
 0x71a   : > { %2675 = vmatpush3.bf16.msra.mxu0 %v2804_v33 }
 0x71b   : > { %2676 = vmatprep.subr.bf16.mxu0 %v2868_v0 }
 0x71e   : > { %2677 = vmatpush3.bf16.msra.mxu0 %v2805_v34 }
 0x7d1   : > { %v1913_v54 = vpop.f32.mrf.mxu0 }
 0x7d2   : > { %v1914_v55 = vadd.f32 %v2444_v53, %v1913_v54 }
 0x7d3   : > { %v1915_v56 = vpop.f32.mrf.mxu0 }
 0x7d4   : > { %v1919_v57 = vmax.f32 %v1914_v55, 0.0 }
 0x7d5   : > { %v1916_v58 = vpop.f32.mrf.mxu0 }
 0x7d6   : > { %v1920_v59 = vpack.c.bf16 %v1919_v57, %v1919_v57 }
 0x7d7   : > { %v1917_v60 = vpop.f32.mrf.mxu0 }
 0x7d8   : > { %v1928_v61 = vsel %vm1926_vm8, %v1920_v59, 0 }
 0x7d9   : > { %2653 = vmatpush3.bf16.msra.mxu1 %v1928_v61 }
 0x7da   : > { %2658 = vmatprep.subr.bf16.mxu1 %v2868_v0 }
 0x7dc   : > { %2655 = vmatmul.mubr.msk.bf16.vlgmr.msra.gmra.mxu1 %vm1922_vm9, %v1921_v62 }
 0x7dd   : > { %2659 = vmatpush3.bf16.msra.mxu1 %v1928_v61  ;;  %2660 = vmatprep.mubr.msk.bf16.mxu1 %vm2869_vm0, %v2868_v0 }
 0x7de   : > { %2664 = vmatprep.subr.bf16.mxu1 %v2868_v0 }
 0x7e4   : > { %2661 = vmatmul.mubr.msk.bf16.vlgmr.msra.gmra.mxu1 %vm1922_vm9, %v2459_v63 }
 0x7e5   : > { %2665 = vmatpush3.bf16.msra.mxu1 %v1928_v61  ;;  %2666 = vmatprep.mubr.msk.bf16.mxu1 %vm2869_vm0, %v2868_v0  ;;  %v2220_v0 = vld [vmem:[%s3503_s17] sm:$0x1] }
 0x7e6   : > { %2170 = vmatprep.subr.bf16.mxu1 %v2870_v4 }
 0x7ec   : > { %2667 = vmatmul.mubr.msk.bf16.vlgmr.msra.gmra.mxu1 %vm1922_vm9, %v2461_v1 }
 0x7ed   : > { %2171 = vmatpush1.bf16.msra.mxu1 %v2790_v2 }
 0x7ee   : > { %2172 = vmatprep.subr.bf16.mxu1 %v2870_v4 }
 0x7f1   : > { %2173 = vmatpush1.bf16.msra.mxu1 %v2791_v3 }
 0x7f2   : > { %2174 = vmatprep.subr.bf16.mxu1 %v2870_v4 }
 0x7f5   : > { %2175 = vmatpush1.bf16.msra.mxu1 %v2792_v5 }
 0x7f6   : > { %2176 = vmatprep.subr.bf16.mxu1 %v2870_v4 }
 0x7f9   : > { %2177 = vmatpush1.bf16.msra.mxu1 %v2793_v6 }
 0x7fa   : > { %2178 = vmatprep.subr.bf16.mxu1 %v2870_v4 }
 0x7fd   : > { %2179 = vmatpush1.bf16.msra.mxu1 %v2794_v7 }
 0x7fe   : > { %2180 = vmatprep.subr.bf16.mxu1 %v2870_v4 }
 0x801   : > { %2181 = vmatpush1.bf16.msra.mxu1 %v2795_v8 }
 0x802   : > { %2182 = vmatprep.subr.bf16.mxu1 %v2870_v4 }
 0x805   : > { %2183 = vmatpush1.bf16.msra.mxu1 %v2796_v9 }
 0x806   : > { %2184 = vmatprep.subr.bf16.mxu1 %v2870_v4 }
 0x809   : > { %2185 = vmatpush1.bf16.msra.mxu1 %v2797_v10 }
 0x80a   : > { %2194 = vmatprep.subr.bf16.mxu1 %v2870_v4 }
 0x80d   : > { %2195 = vmatpush2.bf16.msra.mxu1 %v2798_v11 }
 0x80e   : > { %2196 = vmatprep.subr.bf16.mxu1 %v2870_v4 }
 0x811   : > { %2197 = vmatpush2.bf16.msra.mxu1 %v2799_v12 }
 0x812   : > { %2198 = vmatprep.subr.bf16.mxu1 %v2870_v4 }
 0x815   : > { %2199 = vmatpush2.bf16.msra.mxu1 %v2800_v13 }
 0x816   : > { %2200 = vmatprep.subr.bf16.mxu1 %v2870_v4 }
 0x819   : > { %2201 = vmatpush2.bf16.msra.mxu1 %v2801_v14 }
 0x89c   : > { %v1964_v16 = vpop.f32.mrf.mxu1 }
 0x89d   : > { %v1970_v30 = vpack.c.bf16 %v1964_v16, %v1964_v16 }
 0x89e   : > { %v2656_v18 = vpop.f32.mrf.mxu1 }
 0x8a0   : > { %v1967_v19 = vpop.f32.mrf.mxu1 }
 0x8a2   : > { %v2657_v20 = vpop.f32.mrf.mxu1 }
 0x8a4   : > { %v2010_v4 = vpop.f32.mrf.mxu1 }
 0x8a5   : > { %v2016_v21 = vpack.c.bf16 %v2010_v4, %v2010_v4 }
 0x8a6   : > { %v2662_v22 = vpop.f32.mrf.mxu1 }
 0x8a7   : > { %2064 = vrot.lane.b32.xlu1 %v2016_v21, %s2871_s19 }
 0x8a8   : > { %v2013_v23 = vpop.f32.mrf.mxu1 }
 0x8aa   : > { %v2663_v24 = vpop.f32.mrf.mxu1 }
 0x8ac   : > { %v2056_v25 = vpop.f32.mrf.mxu1 }
 0x8ad   : > { %v2062_v26 = vpack.c.bf16 %v2056_v25, %v2056_v25 }
 0x8ae   : > { %v2668_v27 = vpop.f32.mrf.mxu1 }
 0x8af   : > { %2475 = vmatprep.mubr.msk.bf16.mxu1 %vm1174_vm3, %v2062_v26 }
 0x8b0   : > { %v2059_v28 = vpop.f32.mrf.mxu1 }
 0x8b2   : > { %v2669_v29 = vpop.f32.mrf.mxu1 }
 0x919   : > { %v2065_v31 = vpop.permute.xlu1 %2064 }
 0x91a   : > { %v2068_v32 = vsel %vm1174_vm3, %v1970_v30, %v2065_v31 }
 0x91b   : > { %2203 = vmatmul.mubr.bf16.vlgmr.msra.gmra.mxu1 %v2068_v32 }
 0x9db   : > { %v2204_v36 = vpop.f32.mrf.mxu1 }
 0x9dc   : > { %v2205_v37 = vadd.f32 %v2204_v36, %v2094_v35 }
 0x9dd   : > { %v2206_v38 = vpop.f32.mrf.mxu1 }
 0x9de   : > { %v2210_v39 = vmax.f32 %v2205_v37, 0.0 }
 0x9df   : > { %v2207_v40 = vpop.f32.mrf.mxu1 }
 0x9e0   : > { %v2211_v41 = vpack.c.bf16 %v2210_v39, %v2210_v39 }
 0x9e1   : > { %v2208_v42 = vpop.f32.mrf.mxu1 }
 0x9e2   : > { %2679 = vmatmul.mubr.msk.bf16.vlgmr.msra.gmra.mxu0 %vm1174_vm3, %v2211_v41 }
 0xaa2   : > { %v2282_v43 = vpop.f32.mrf.mxu0 }
 0xaa3   : > { %v2283_v44 = vadd.f32 %v2282_v43, %v2220_v0 }
 0xaa4   : > { %v2680_v45 = vpop.f32.mrf.mxu0 }
 0xaa5   : > { %2289 = vst.msk [vmem:[%s567_s20] sm:$0x1] %vm2288_vm10, %v2283_v44 }
 0xaa6   : > { %v2285_v46 = vpop.f32.mrf.mxu0 }
 0xaa7   : > { %2819 = shalt.err (!%p2816_p3)
}
 0xaa8   : > { %s2820_s23 = scalar_lea.hbm %s3445_s26, 16  ;;  %s2824_s19 = scalar_lea.hbm %s3535_s25, 32 }
 0xaa9   : > { %p2821_p4 = scmp.ne.s32.totalorder %s3445_s26, %s2820_s23  ;;  %p2825_p9 = scmp.lt.s32.totalorder %s3445_s26, %s3535_s25 }
 0xaaa   : > { %p2826_p10 = scmp.lt.s32.totalorder %s2824_s19, %s2820_s23 }
 0xaab   : > { %p2822_p7 = pnand %p2821_p4, %p3006_p5 }
 0xaac   : > { %p2827_p11 = por %p2826_p10, %p2825_p9 }
 0xaad   : > { %p2823_p8 = pneg %p2822_p7 }
 0xaaf   : > { %p2828_p12 = pnand %p2827_p11, %p2823_p8 }
 0xab1   : > { %2831 = shalt.err (!%p2828_p12)
}
 0xab2   : > { %2682 = dma.vmem_to_hbm [thread:$0]  (%p3006_p5), %s3447_s21, 16, %s3445_s26, %s2291_s29   ;;  %v2681_v47 = vpop.f32.mrf.mxu0 }
 0xab3 PF: > { %s3536_s0 = sld [smem:[#allocation7_spill]] }
 0xab4   : > { %s3537_s30 = sld [smem:[#allocation5_spill]] }
 0xab9   : > { %p2688_p13 = scmp.ge.s32.totalorder %s3536_s0, 2 }
 0xaba   : > { %s2315_s22 = sand.u32 1, %s3537_s30  }
 0xabb   : > { %p2685_p0 = pnand %p2688_p13, %p3010_p6  ;;  %s2316_s1 = scalar_lea.sflag [#allocation3], %s2315_s22 }
 0xabd   : > { %p2686_p1 = pneg %p2685_p0 }
 0xabf   : > { %2849 = dma.done.wait (%p2686_p1), %s2316_s1, 16  }
 0xac0   : > { %2851 = vsyncadd (%p2686_p1), %s2316_s1, 4294967280  ;;  %s3539_s30 = sld [smem:[#allocation8_spill]]  ;;  %s3542_s27 = smov %s2858_s28 }
 0xac1   : > { %s3540_s23 = sld [smem:[#allocation6_spill]] }
 0xac2   : > { %s3541_s29 = sld [smem:[#allocation9_spill]] }
 0xac6   : > { %p28_p2 = scmp.ge.s32.totalorder %s3539_s30, 4  }
 0xac7   : > { %s3543_s28 = smov %s3540_s23 }
 0xac8   :  { %30 = sbr.rel (!%p28_p2) target bundleno = 8 (0x8), region = 137 }
 0xacd   :  { %2320 = vsyncpa [#allocation3], 1 }
 0xace   :  { %2322 = vsyncpa [#allocation3 + $0x1], 1 }

</bundles_post_ra>
